<compile_context>
chip_gen: v7x
topology: tpu7x:2x2x1
jax: 0.10.0
libtpu: 0.0.40
codegen_flags: <defaults>
</compile_context>

<pallas_src>
import functools

import jax
import jax.numpy as jnp
from jax import lax
from jax.experimental import pallas as pl
from jax.experimental.pallas import tpu as pltpu


def _cdiv(a, b):
    return (a + b - 1) // b


def _vmem_capacity_bytes():
    try:
        return int(pltpu.get_tpu_info().vmem_capacity_bytes)
    except Exception:
        return 128 * 1024 * 1024   # v5e/v6e default assumption


def _choose_tiles(B, C, HW_in, HW_out, x_itemsize, vmem_capacity):
    """Pick (TB, TN): batch packing factor and output-pixel tile size."""
    small_vmem = vmem_capacity < 96 * 1024 * 1024          # v7x: 64 MiB / TC
    wmat_budget = (8 if small_vmem else 16) * 1024 * 1024  # slab-temp budget
    io_budget = (4 if small_vmem else 8) * 1024 * 1024     # double-buffered x/out

    # TN: lane-dense, multiple of 256 when possible (clean MXU N-passes on
    # v6e/v7x), shrunk until ~3 slab-sized temporaries fit the budget.
    if HW_out <= 128:
        tn = HW_out                      # must equal the full dim when < 128
    else:
        quantum = 256 if HW_out >= 256 else 128
        tn_max = (HW_out // quantum) * quantum
        tn = min(1024, tn_max)
        while tn > quantum and 3 * HW_in * tn * 4 > wmat_budget:
            tn -= quantum

    # TB: pack batch elements per grid step (amortizes ~0.35us/step overhead
    # on small maps). Must divide B.
    tb = 1
    for cand in range(min(B, 8), 0, -1):
        if B % cand == 0 and 2 * cand * C * (HW_in + tn) * x_itemsize <= io_budget:
            tb = cand
            break

    # Guarantee >= 2 grid steps on a parallel axis so v7x's two TensorCores
    # both get work (no effect on v5e/v6e single-TC parts).
    n_tiles = _cdiv(HW_out, tn)
    if n_tiles == 1 and B // tb == 1 and B >= 2:
        for cand in range(B // 2, 0, -1):
            if B % cand == 0:
                tb = cand
                break
    return tb, tn


def _affine_grid_sample_kernel(theta_ref, grid_ref, x_ref, out_ref, *,
                               H_in, W_in, TB, compute_dtype, flat_out, unroll):
    # theta_ref: SMEM (B*6,)   flat layout avoids 2-D SMEM padding blow-up
    # grid_ref:  VMEM (2, TN)  rows: xs, ys (normalized base-grid slab)
    # x_ref:     VMEM (TB, C, HW_in)
    # out_ref:   VMEM (TB, C, TN)  or  (TB, 1, C*TN) when flat_out
    HW_in = H_in * W_in
    b0 = pl.program_id(0) * TB

    xs = grid_ref[0:1, :]                 # (1, TN)
    ys = grid_ref[1:2, :]                 # (1, TN)

    # Input flat-pixel index along sublanes (hoisted out of the batch loop).
    in_row = lax.broadcasted_iota(jnp.int32, (HW_in, 1), 0)

    def per_batch(bb, carry):
        b = b0 + bb
        t00 = theta_ref[b * 6 + 0]
        t01 = theta_ref[b * 6 + 1]
        t02 = theta_ref[b * 6 + 2]
        t10 = theta_ref[b * 6 + 3]
        t11 = theta_ref[b * 6 + 4]
        t12 = theta_ref[b * 6 + 5]

        # affine_grid: grid_x = t00*x + t01*y + t02 ; grid_y = t10*x + t11*y + t12
        gx = t00 * xs + t01 * ys + t02
        gy = t10 * xs + t11 * ys + t12

        # grid_sample unnormalize (align_corners=False); clamp so extreme
        # theta cannot overflow the int32 flat index (clamped pixels are all
        # out of range, so the validity masks below are unchanged).
        ix = ((gx + 1.0) * W_in - 1.0) * 0.5
        iy = ((gy + 1.0) * H_in - 1.0) * 0.5
        ix = jnp.clip(ix, -2.0, float(W_in) + 1.0)
        iy = jnp.clip(iy, -2.0, float(H_in) + 1.0)

        ix0f = jnp.floor(ix)
        iy0f = jnp.floor(iy)
        ix0 = ix0f.astype(jnp.int32)
        iy0 = iy0f.astype(jnp.int32)

        wx1 = ix - ix0f
        wx0 = 1.0 - wx1
        wy1 = iy - iy0f
        wy0 = 1.0 - wy1

        vx0 = (ix0 >= 0) & (ix0 < W_in)
        vx1 = (ix0 + 1 >= 0) & (ix0 + 1 < W_in)
        vy0 = (iy0 >= 0) & (iy0 < H_in)
        vy1 = (iy0 + 1 >= 0) & (iy0 + 1 < H_in)

        # Zero invalid-corner weights BEFORE building the slab: an invalid
        # corner's flat index may alias a valid pixel.  These are cheap
        # (1, TN) VPU ops; pre-cast to compute_dtype for the selects.
        w00 = jnp.where(vy0 & vx0, wy0 * wx0, 0.0).astype(compute_dtype)
        w01 = jnp.where(vy0 & vx1, wy0 * wx1, 0.0).astype(compute_dtype)
        w10 = jnp.where(vy1 & vx0, wy1 * wx0, 0.0).astype(compute_dtype)
        w11 = jnp.where(vy1 & vx1, wy1 * wx1, 0.0).astype(compute_dtype)

        flat00 = iy0 * W_in + ix0              # (1, TN), bounded by the clamp
        diff = in_row - flat00                 # single slab-sized int op

        zero = jnp.zeros((), compute_dtype)
        if W_in > 1:
            # The four corner offsets (0, 1, W_in, W_in+1) are distinct, so
            # the hits are mutually exclusive per element: nested selects
            # replace 4x(compare->cast->mul)+3 adds (~15 slab ops -> ~9).
            wmat = jnp.where(diff == 0, w00,
                   jnp.where(diff == 1, w01,
                   jnp.where(diff == W_in, w10,
                   jnp.where(diff == W_in + 1, w11, zero))))
        else:
            # Degenerate W_in == 1: offsets collide; keep the additive path.
            wmat = ((diff == 0).astype(compute_dtype) * w00 +
                    (diff == 1).astype(compute_dtype) * w01 +
                    (diff == W_in).astype(compute_dtype) * w10 +
                    (diff == W_in + 1).astype(compute_dtype) * w11)

        x_cm = x_ref[bb].astype(compute_dtype)                 # (C, HW_in)
        out = jnp.dot(x_cm, wmat, preferred_element_type=jnp.float32)  # (C, TN) f32
        if flat_out:
            out_ref[bb] = out.astype(out_ref.dtype).reshape(1, -1)
        else:
            out_ref[bb] = out.astype(out_ref.dtype)
        return carry

    lax.fori_loop(0, TB, per_batch, None, unroll=unroll)


class STAffinePallas:
    """Pallas equivalent of ST_Affine. input_shape = (C, H_out, W_out)."""

    def __init__(self, input_shape):
        self.input_shape = tuple(input_shape)

    def dim(self):
        return 6

    def trans_theta(self, theta):
        return theta

    def __call__(self, x, theta, inverse=False, compute_dtype=None):
        B, C, H_in, W_in = x.shape
        _, H_out, W_out = self.input_shape   # channel count comes from x

        theta = theta.astype(jnp.float32)
        if inverse:
            A = theta[:, :4].reshape(-1, 2, 2)
            b = theta[:, 4:]
            det = A[:, 0, 0] * A[:, 1, 1] - A[:, 0, 1] * A[:, 1, 0]
            A_inv = jnp.stack(
                [A[:, 1, 1], -A[:, 0, 1], -A[:, 1, 0], A[:, 0, 0]], axis=1
            ) / det[:, None]
            theta = jnp.concatenate([A_inv, -b], axis=1)
        theta_flat = theta.reshape(B, 6).reshape(-1)   # 1-D SMEM layout

        HW_in = H_in * W_in
        HW_out = H_out * W_out
        x_flat = x.reshape(B, C, HW_in)

        # bf16 is MXU-native on v6e/v7x (f32xf32 is emulated multi-pass);
        # pass compute_dtype=jnp.float32 for exact PyTorch-f32 semantics.
        cdt = jnp.bfloat16 if compute_dtype is None else jnp.dtype(compute_dtype)

        vmem_cap = _vmem_capacity_bytes()
        TB, TN = _choose_tiles(B, C, HW_in, HW_out, x.dtype.itemsize, vmem_cap)
        n_tiles = _cdiv(HW_out, TN)
        grid = (B // TB, n_tiles)

        # Lane-dense output slab for tiny maps (avoids masked partial stores).
        flat_out = HW_out < 128   # implies n_tiles == 1 and TN == HW_out

        # Batch-invariant normalized base grid (align_corners=False), streamed
        # in as a tiny (2, TN) VMEM slab per step.
        jj = jnp.arange(W_out, dtype=jnp.float32)
        ii = jnp.arange(H_out, dtype=jnp.float32)
        xs = (2.0 * jj + 1.0) / float(W_out) - 1.0
        ys = (2.0 * ii + 1.0) / float(H_out) - 1.0
        base_grid = jnp.stack([jnp.tile(xs, H_out), jnp.repeat(ys, W_out)], axis=0)

        # Only fully unroll the per-batch loop when the slab temporaries are
        # small; unrolling big slabs bloats live VMEM ranges (spills on v7x).
        unroll = (HW_in * TN * 4) <= (1 << 20)

        kernel = functools.partial(
            _affine_grid_sample_kernel,
            H_in=H_in, W_in=W_in, TB=TB, compute_dtype=cdt,
            flat_out=flat_out, unroll=unroll)

        if flat_out:
            out_shape = jax.ShapeDtypeStruct((B, 1, C * HW_out), x.dtype)
            out_spec = pl.BlockSpec((TB, 1, C * HW_out), lambda b, n: (b, 0, 0))
        else:
            out_shape = jax.ShapeDtypeStruct((B, C, HW_out), x.dtype)
            out_spec = pl.BlockSpec((TB, C, TN), lambda b, n: (b, 0, n))

        vmem_limit = (48 if vmem_cap < 96 * 1024 * 1024 else 64) * 1024 * 1024

        out = pl.pallas_call(
            kernel,
            out_shape=out_shape,
            grid=grid,
            in_specs=[
                # whole flat theta lives in SMEM; indexed per batch element
                pl.BlockSpec(memory_space=pltpu.MemorySpace.SMEM),
                pl.BlockSpec((2, TN), lambda b, n: (0, n)),
                pl.BlockSpec((TB, C, HW_in), lambda b, n: (b, 0, 0)),
            ],
            out_specs=out_spec,
            compiler_params=pltpu.CompilerParams(
                dimension_semantics=("parallel", "parallel"),
                vmem_limit_bytes=vmem_limit),
        )(theta_flat, base_grid, x_flat)
        return out.reshape(B, C, H_out, W_out)


def _ref_affine_grid_sample(x, theta, out_hw):
    """Pure-JAX reference for F.affine_grid + F.grid_sample (bilinear, zeros,
    align_corners=False)."""
    B, C, H_in, W_in = x.shape
    H_out, W_out = out_hw
    jj = (2.0 * jnp.arange(W_out, dtype=jnp.float32) + 1.0) / W_out - 1.0
    ii = (2.0 * jnp.arange(H_out, dtype=jnp.float32) + 1.0) / H_out - 1.0
    xs, ys = jnp.meshgrid(jj, ii)                       # (H_out, W_out)
    base = jnp.stack([xs, ys, jnp.ones_like(xs)], axis=-1)
    g = jnp.einsum('hwk,bik->bhwi', base, theta.reshape(B, 2, 3))
    gx, gy = g[..., 0], g[..., 1]
    ix = ((gx + 1.0) * W_in - 1.0) * 0.5
    iy = ((gy + 1.0) * H_in - 1.0) * 0.5
    ix0 = jnp.floor(ix)
    iy0 = jnp.floor(iy)
    wx1 = ix - ix0
    wx0 = 1.0 - wx1
    wy1 = iy - iy0
    wy0 = 1.0 - wy1

    b_idx = jnp.arange(B)[:, None, None, None]
    c_idx = jnp.arange(C)[None, :, None, None]

    def gather(iyc, ixc, w):
        valid = (iyc >= 0) & (iyc < H_in) & (ixc >= 0) & (ixc < W_in)
        w = jnp.where(valid, w, 0.0)
        iyi = jnp.clip(iyc, 0, H_in - 1).astype(jnp.int32)
        ixi = jnp.clip(ixc, 0, W_in - 1).astype(jnp.int32)
        vals = x[b_idx, c_idx, iyi[:, None], ixi[:, None]]
        return vals * w[:, None]

    return (gather(iy0, ix0, wy0 * wx0) + gather(iy0, ix0 + 1, wy0 * wx1) +
            gather(iy0 + 1, ix0, wy1 * wx0) + gather(iy0 + 1, ix0 + 1, wy1 * wx1))


if __name__ == "__main__":
    key = jax.random.PRNGKey(0)
    k1, k2, k3 = jax.random.split(key, 3)

    B, C, H, W = 2, 4, 16, 16
    x = jax.random.normal(k1, (B, C, H, W), dtype=jnp.float32)
    st = STAffinePallas((C, H, W))

    theta_id = jnp.tile(jnp.array([[1., 0., 0., 0., 1., 0.]], jnp.float32), (B, 1))
    theta = theta_id + 0.1 * jax.random.normal(k2, (B, 6), dtype=jnp.float32)
    ref = _ref_affine_grid_sample(x, theta, (H, W))

    # 1) Exact-f32 path: identity theta reproduces the input.
    out_id = jax.block_until_ready(st(x, theta_id, compute_dtype=jnp.float32))
    assert jnp.allclose(out_id, x, atol=1e-5), "identity transform mismatch"

    # 2) Exact-f32 path vs pure-JAX reference.
    out_f32 = jax.block_until_ready(st(x, theta, compute_dtype=jnp.float32))
    assert out_f32.shape == (B, C, H, W)
    assert jnp.allclose(out_f32, ref, atol=1e-4, rtol=1e-4), "f32 path mismatch"

    # 3) Default (bf16 MXU) path within bf16 tolerance of the reference.
    out_bf16 = jax.block_until_ready(st(x, theta))
    assert jnp.allclose(out_bf16, ref, atol=5e-2, rtol=5e-2), "bf16 path mismatch"

    # 4) Inverse branch (module semantics: A^{-1}, -b).
    A = theta[:, :4].reshape(-1, 2, 2)
    b_vec = theta[:, 4:]
    theta_inv = jnp.concatenate(
        [jnp.linalg.inv(A).reshape(-1, 4), -b_vec], axis=1)
    ref_inv = _ref_affine_grid_sample(x, theta_inv, (H, W))
    out_inv = jax.block_until_ready(st(x, theta, inverse=True))
    assert out_inv.shape == (B, C, H, W)
    assert jnp.allclose(out_inv, ref_inv, atol=5e-2, rtol=5e-2), "inverse mismatch"

    # 5) Tiny feature map exercises the lane-dense flat-output path.
    H2 = W2 = 8
    x2 = jax.random.normal(k3, (B, C, H2, W2), dtype=jnp.float32)
    st2 = STAffinePallas((C, H2, W2))
    out_small = jax.block_until_ready(st2(x2, theta, compute_dtype=jnp.float32))
    ref_small = _ref_affine_grid_sample(x2, theta, (H2, W2))
    assert jnp.allclose(out_small, ref_small, atol=1e-4, rtol=1e-4), "tiny-map mismatch"

    print("KERNEL_OK")
</pallas_src>

<mosaic_0001>
module attributes {stable_mosaic.version = 11 : i64} {
  func.func @_affine_grid_sample_kernel(%arg0: i32, %arg1: i32, %arg2: memref<12xf32, #tpu.memory_space<smem>>, %arg3: memref<2x256xf32, #tpu.memory_space<vmem>>, %arg4: memref<1x4x256xf32, #tpu.memory_space<vmem>>, %arg5: memref<1x4x256xf32, #tpu.memory_space<vmem>>) attributes {dimension_semantics = [#tpu.dimension_semantics<parallel>, #tpu.dimension_semantics<parallel>], iteration_bounds = array<i64: 2, 1>, scalar_prefetch = 0 : i64, scratch_operands = 0 : i64, tpu.core_type = #tpu.core_type<tc>, window_params = [{transform_indices = @transform_0, window_bounds = array<i64: 12>}, {transform_indices = @transform_1, window_bounds = array<i64: 2, 256>}, {transform_indices = @transform_2, window_bounds = array<i64: 1, 4, 256>}, {transform_indices = @transform_3, window_bounds = array<i64: 1, 4, 256>}]} {
    %c1_i32 = arith.constant 1 : i32
    %0 = arith.muli %arg0, %c1_i32 : i32
    %c0 = arith.constant 0 : index
    %c0_0 = arith.constant 0 : index
    %1 = vector.load %arg3[%c0, %c0_0] : memref<2x256xf32, #tpu.memory_space<vmem>>, vector<1x256xf32>
    %c1 = arith.constant 1 : index
    %c0_1 = arith.constant 0 : index
    %2 = vector.load %arg3[%c1, %c0_1] : memref<2x256xf32, #tpu.memory_space<vmem>>, vector<1x256xf32>
    %3 = tpu.iota {dimensions = array<i32: 0>} : vector<256x1xi32>
    %c0_i32 = arith.constant 0 : i32
    %4 = arith.addi %0, %c0_i32 : i32
    %c6_i32 = arith.constant 6 : i32
    %5 = arith.muli %4, %c6_i32 : i32
    %c0_i32_2 = arith.constant 0 : i32
    %6 = arith.addi %5, %c0_i32_2 : i32
    %7 = arith.index_cast %6 : i32 to index
    %8 = memref.load %arg2[%7] : memref<12xf32, #tpu.memory_space<smem>>
    %c6_i32_3 = arith.constant 6 : i32
    %9 = arith.muli %4, %c6_i32_3 : i32
    %c1_i32_4 = arith.constant 1 : i32
    %10 = arith.addi %9, %c1_i32_4 : i32
    %11 = arith.index_cast %10 : i32 to index
    %12 = memref.load %arg2[%11] : memref<12xf32, #tpu.memory_space<smem>>
    %c6_i32_5 = arith.constant 6 : i32
    %13 = arith.muli %4, %c6_i32_5 : i32
    %c2_i32 = arith.constant 2 : i32
    %14 = arith.addi %13, %c2_i32 : i32
    %15 = arith.index_cast %14 : i32 to index
    %16 = memref.load %arg2[%15] : memref<12xf32, #tpu.memory_space<smem>>
    %c6_i32_6 = arith.constant 6 : i32
    %17 = arith.muli %4, %c6_i32_6 : i32
    %c3_i32 = arith.constant 3 : i32
    %18 = arith.addi %17, %c3_i32 : i32
    %19 = arith.index_cast %18 : i32 to index
    %20 = memref.load %arg2[%19] : memref<12xf32, #tpu.memory_space<smem>>
    %c6_i32_7 = arith.constant 6 : i32
    %21 = arith.muli %4, %c6_i32_7 : i32
    %c4_i32 = arith.constant 4 : i32
    %22 = arith.addi %21, %c4_i32 : i32
    %23 = arith.index_cast %22 : i32 to index
    %24 = memref.load %arg2[%23] : memref<12xf32, #tpu.memory_space<smem>>
    %c6_i32_8 = arith.constant 6 : i32
    %25 = arith.muli %4, %c6_i32_8 : i32
    %c5_i32 = arith.constant 5 : i32
    %26 = arith.addi %25, %c5_i32 : i32
    %27 = arith.index_cast %26 : i32 to index
    %28 = memref.load %arg2[%27] : memref<12xf32, #tpu.memory_space<smem>>
    %29 = vector.broadcast %8 : f32 to vector<1x256xf32>
    %30 = arith.mulf %29, %1 : vector<1x256xf32>
    %31 = vector.broadcast %12 : f32 to vector<1x256xf32>
    %32 = arith.mulf %31, %2 : vector<1x256xf32>
    %33 = arith.addf %30, %32 : vector<1x256xf32>
    %34 = vector.broadcast %16 : f32 to vector<1x256xf32>
    %35 = arith.addf %33, %34 : vector<1x256xf32>
    %36 = vector.broadcast %20 : f32 to vector<1x256xf32>
    %37 = arith.mulf %36, %1 : vector<1x256xf32>
    %38 = vector.broadcast %24 : f32 to vector<1x256xf32>
    %39 = arith.mulf %38, %2 : vector<1x256xf32>
    %40 = arith.addf %37, %39 : vector<1x256xf32>
    %41 = vector.broadcast %28 : f32 to vector<1x256xf32>
    %42 = arith.addf %40, %41 : vector<1x256xf32>
    %cst = arith.constant 1.000000e+00 : f32
    %43 = vector.broadcast %cst : f32 to vector<1x256xf32>
    %44 = arith.addf %35, %43 : vector<1x256xf32>
    %cst_9 = arith.constant 1.600000e+01 : f32
    %45 = vector.broadcast %cst_9 : f32 to vector<1x256xf32>
    %46 = arith.mulf %44, %45 : vector<1x256xf32>
    %cst_10 = arith.constant 1.000000e+00 : f32
    %47 = vector.broadcast %cst_10 : f32 to vector<1x256xf32>
    %48 = arith.subf %46, %47 : vector<1x256xf32>
    %cst_11 = arith.constant 5.000000e-01 : f32
    %49 = vector.broadcast %cst_11 : f32 to vector<1x256xf32>
    %50 = arith.mulf %48, %49 : vector<1x256xf32>
    %cst_12 = arith.constant 1.000000e+00 : f32
    %51 = vector.broadcast %cst_12 : f32 to vector<1x256xf32>
    %52 = arith.addf %42, %51 : vector<1x256xf32>
    %cst_13 = arith.constant 1.600000e+01 : f32
    %53 = vector.broadcast %cst_13 : f32 to vector<1x256xf32>
    %54 = arith.mulf %52, %53 : vector<1x256xf32>
    %cst_14 = arith.constant 1.000000e+00 : f32
    %55 = vector.broadcast %cst_14 : f32 to vector<1x256xf32>
    %56 = arith.subf %54, %55 : vector<1x256xf32>
    %cst_15 = arith.constant 5.000000e-01 : f32
    %57 = vector.broadcast %cst_15 : f32 to vector<1x256xf32>
    %58 = arith.mulf %56, %57 : vector<1x256xf32>
    %cst_16 = arith.constant -2.000000e+00 : f32
    %cst_17 = arith.constant 1.700000e+01 : f32
    %59 = vector.broadcast %cst_16 : f32 to vector<1x256xf32>
    %60 = arith.maximumf %59, %50 : vector<1x256xf32>
    %61 = vector.broadcast %cst_17 : f32 to vector<1x256xf32>
    %62 = arith.minimumf %61, %60 : vector<1x256xf32>
    %cst_18 = arith.constant -2.000000e+00 : f32
    %cst_19 = arith.constant 1.700000e+01 : f32
    %63 = vector.broadcast %cst_18 : f32 to vector<1x256xf32>
    %64 = arith.maximumf %63, %58 : vector<1x256xf32>
    %65 = vector.broadcast %cst_19 : f32 to vector<1x256xf32>
    %66 = arith.minimumf %65, %64 : vector<1x256xf32>
    %67 = math.floor %62 : vector<1x256xf32>
    %68 = math.floor %66 : vector<1x256xf32>
    %69 = arith.fptosi %67 : vector<1x256xf32> to vector<1x256xi32>
    %70 = arith.fptosi %68 : vector<1x256xf32> to vector<1x256xi32>
    %71 = arith.subf %62, %67 : vector<1x256xf32>
    %cst_20 = arith.constant 1.000000e+00 : f32
    %72 = vector.broadcast %cst_20 : f32 to vector<1x256xf32>
    %73 = arith.subf %72, %71 : vector<1x256xf32>
    %74 = arith.subf %66, %68 : vector<1x256xf32>
    %cst_21 = arith.constant 1.000000e+00 : f32
    %75 = vector.broadcast %cst_21 : f32 to vector<1x256xf32>
    %76 = arith.subf %75, %74 : vector<1x256xf32>
    %c0_i32_22 = arith.constant 0 : i32
    %77 = vector.broadcast %c0_i32_22 : i32 to vector<1x256xi32>
    %78 = arith.cmpi sge, %69, %77 : vector<1x256xi32>
    %c16_i32 = arith.constant 16 : i32
    %79 = vector.broadcast %c16_i32 : i32 to vector<1x256xi32>
    %80 = arith.cmpi slt, %69, %79 : vector<1x256xi32>
    %81 = arith.andi %78, %80 : vector<1x256xi1>
    %c1_i32_23 = arith.constant 1 : i32
    %82 = vector.broadcast %c1_i32_23 : i32 to vector<1x256xi32>
    %83 = arith.addi %69, %82 : vector<1x256xi32>
    %c0_i32_24 = arith.constant 0 : i32
    %84 = vector.broadcast %c0_i32_24 : i32 to vector<1x256xi32>
    %85 = arith.cmpi sge, %83, %84 : vector<1x256xi32>
    %c1_i32_25 = arith.constant 1 : i32
    %86 = vector.broadcast %c1_i32_25 : i32 to vector<1x256xi32>
    %87 = arith.addi %69, %86 : vector<1x256xi32>
    %c16_i32_26 = arith.constant 16 : i32
    %88 = vector.broadcast %c16_i32_26 : i32 to vector<1x256xi32>
    %89 = arith.cmpi slt, %87, %88 : vector<1x256xi32>
    %90 = arith.andi %85, %89 : vector<1x256xi1>
    %c0_i32_27 = arith.constant 0 : i32
    %91 = vector.broadcast %c0_i32_27 : i32 to vector<1x256xi32>
    %92 = arith.cmpi sge, %70, %91 : vector<1x256xi32>
    %c16_i32_28 = arith.constant 16 : i32
    %93 = vector.broadcast %c16_i32_28 : i32 to vector<1x256xi32>
    %94 = arith.cmpi slt, %70, %93 : vector<1x256xi32>
    %95 = arith.andi %92, %94 : vector<1x256xi1>
    %c1_i32_29 = arith.constant 1 : i32
    %96 = vector.broadcast %c1_i32_29 : i32 to vector<1x256xi32>
    %97 = arith.addi %70, %96 : vector<1x256xi32>
    %c0_i32_30 = arith.constant 0 : i32
    %98 = vector.broadcast %c0_i32_30 : i32 to vector<1x256xi32>
    %99 = arith.cmpi sge, %97, %98 : vector<1x256xi32>
    %c1_i32_31 = arith.constant 1 : i32
    %100 = vector.broadcast %c1_i32_31 : i32 to vector<1x256xi32>
    %101 = arith.addi %70, %100 : vector<1x256xi32>
    %c16_i32_32 = arith.constant 16 : i32
    %102 = vector.broadcast %c16_i32_32 : i32 to vector<1x256xi32>
    %103 = arith.cmpi slt, %101, %102 : vector<1x256xi32>
    %104 = arith.andi %99, %103 : vector<1x256xi1>
    %105 = arith.andi %95, %81 : vector<1x256xi1>
    %106 = arith.mulf %76, %73 : vector<1x256xf32>
    %cst_33 = arith.constant 0.000000e+00 : f32
    %107 = vector.broadcast %cst_33 : f32 to vector<1x256xf32>
    %108 = arith.select %105, %106, %107 : vector<1x256xi1>, vector<1x256xf32>
    %109 = arith.andi %95, %90 : vector<1x256xi1>
    %110 = arith.mulf %76, %71 : vector<1x256xf32>
    %cst_34 = arith.constant 0.000000e+00 : f32
    %111 = vector.broadcast %cst_34 : f32 to vector<1x256xf32>
    %112 = arith.select %109, %110, %111 : vector<1x256xi1>, vector<1x256xf32>
    %113 = arith.andi %104, %81 : vector<1x256xi1>
    %114 = arith.mulf %74, %73 : vector<1x256xf32>
    %cst_35 = arith.constant 0.000000e+00 : f32
    %115 = vector.broadcast %cst_35 : f32 to vector<1x256xf32>
    %116 = arith.select %113, %114, %115 : vector<1x256xi1>, vector<1x256xf32>
    %117 = arith.andi %104, %90 : vector<1x256xi1>
    %118 = arith.mulf %74, %71 : vector<1x256xf32>
    %cst_36 = arith.constant 0.000000e+00 : f32
    %119 = vector.broadcast %cst_36 : f32 to vector<1x256xf32>
    %120 = arith.select %117, %118, %119 : vector<1x256xi1>, vector<1x256xf32>
    %c16_i32_37 = arith.constant 16 : i32
    %121 = vector.broadcast %c16_i32_37 : i32 to vector<1x256xi32>
    %122 = arith.muli %70, %121 : vector<1x256xi32>
    %123 = arith.addi %122, %69 : vector<1x256xi32>
    %124 = vector.broadcast %3 : vector<256x1xi32> to vector<256x256xi32>
    %125 = vector.broadcast %123 : vector<1x256xi32> to vector<256x256xi32>
    %126 = arith.subi %124, %125 : vector<256x256xi32>
    %c0_i32_38 = arith.constant 0 : i32
    %127 = vector.broadcast %c0_i32_38 : i32 to vector<256x256xi32>
    %128 = arith.cmpi eq, %126, %127 : vector<256x256xi32>
    %c1_i32_39 = arith.constant 1 : i32
    %129 = vector.broadcast %c1_i32_39 : i32 to vector<256x256xi32>
    %130 = arith.cmpi eq, %126, %129 : vector<256x256xi32>
    %c16_i32_40 = arith.constant 16 : i32
    %131 = vector.broadcast %c16_i32_40 : i32 to vector<256x256xi32>
    %132 = arith.cmpi eq, %126, %131 : vector<256x256xi32>
    %c17_i32 = arith.constant 17 : i32
    %133 = vector.broadcast %c17_i32 : i32 to vector<256x256xi32>
    %134 = arith.cmpi eq, %126, %133 : vector<256x256xi32>
    %cst_41 = arith.constant 0.000000e+00 : f32
    %135 = vector.shape_cast %120 : vector<1x256xf32> to vector<1x256xf32>
    %136 = vector.broadcast %135 : vector<1x256xf32> to vector<256x256xf32>
    %137 = vector.broadcast %cst_41 : f32 to vector<256x256xf32>
    %138 = arith.select %134, %136, %137 : vector<256x256xi1>, vector<256x256xf32>
    %139 = vector.shape_cast %116 : vector<1x256xf32> to vector<1x256xf32>
    %140 = vector.broadcast %139 : vector<1x256xf32> to vector<256x256xf32>
    %141 = arith.select %132, %140, %138 : vector<256x256xi1>, vector<256x256xf32>
    %142 = vector.shape_cast %112 : vector<1x256xf32> to vector<1x256xf32>
    %143 = vector.broadcast %142 : vector<1x256xf32> to vector<256x256xf32>
    %144 = arith.select %130, %143, %141 : vector<256x256xi1>, vector<256x256xf32>
    %145 = vector.shape_cast %108 : vector<1x256xf32> to vector<1x256xf32>
    %146 = vector.broadcast %145 : vector<1x256xf32> to vector<256x256xf32>
    %147 = arith.select %128, %146, %144 : vector<256x256xi1>, vector<256x256xf32>
    %148 = arith.index_cast %c0_i32 : i32 to index
    %c0_42 = arith.constant 0 : index
    %c0_43 = arith.constant 0 : index
    %149 = vector.load %arg4[%148, %c0_42, %c0_43] : memref<1x4x256xf32, #tpu.memory_space<vmem>>, vector<1x4x256xf32>
    %150 = vector.shape_cast %149 : vector<1x4x256xf32> to vector<4x256xf32>
    %cst_44 = arith.constant dense<0.000000e+00> : vector<4x256xf32>
    %151 = tpu.matmul %150, %147, %cst_44 {dimension_numbers = #tpu.dot_dimension_numbers<[1], [0], [0], [1], [0, 0, 1, 1], [], []>} : vector<4x256xf32>, vector<256x256xf32>, vector<4x256xf32> -> vector<4x256xf32>
    %152 = arith.index_cast %c0_i32 : i32 to index
    %c0_45 = arith.constant 0 : index
    %c0_46 = arith.constant 0 : index
    %153 = vector.load %arg5[%152, %c0_45, %c0_46] : memref<1x4x256xf32, #tpu.memory_space<vmem>>, vector<1x4x256xf32>
    %154 = vector.shape_cast %153 : vector<1x4x256xf32> to vector<4x256xf32>
    %155 = vector.shape_cast %151 : vector<4x256xf32> to vector<1x4x256xf32>
    tpu.vector_store %arg5[%152, %c0_45, %c0_46], %155 {strides = array<i32>} : memref<1x4x256xf32, #tpu.memory_space<vmem>>, vector<1x4x256xf32>,
    %c1_i32_47 = arith.constant 1 : i32
    return
  }
  func.func @transform_0(%arg0: i32, %arg1: i32) -> i32 {
    %c0_i32 = arith.constant 0 : i32
    %c0_i32_0 = arith.constant 0 : i32
    return %c0_i32 : i32
  }
  func.func @transform_1(%arg0: i32, %arg1: i32) -> (i32, i32) {
    %c0_i32 = arith.constant 0 : i32
    %c0_i32_0 = arith.constant 0 : i32
    return %c0_i32, %arg1 : i32, i32
  }
  func.func @transform_2(%arg0: i32, %arg1: i32) -> (i32, i32, i32) {
    %c0_i32 = arith.constant 0 : i32
    %c0_i32_0 = arith.constant 0 : i32
    %c0_i32_1 = arith.constant 0 : i32
    return %arg0, %c0_i32, %c0_i32_0 : i32, i32, i32
  }
  func.func @transform_3(%arg0: i32, %arg1: i32) -> (i32, i32, i32) {
    %c0_i32 = arith.constant 0 : i32
    %c0_i32_0 = arith.constant 0 : i32
    return %arg0, %c0_i32, %arg1 : i32, i32, i32
  }
}

</mosaic_0001>

<bundles_post_ra>
// kernel: tpu_custom_call.1
= control target key start
LH: loop header
LB: loop body
LE: loop exit
PB: predicated region body
PF: predicated region fallthrough
CT: control target
= control target key end

     0   :  { %8 = vsyncpa [#allocation5], 0  ;;  %s2470_s0 = inlined_call_operand.hbm [shape: f32[12], index: 0, kind: input, shape index: {}]   ;;  %s2471_s1 = inlined_call_operand.hbm [shape: f32[2,256], index: 1, kind: input, shape index: {}]   ;;  %s2472_s2 = inlined_call_operand.hbm [shape: f32[2,4,256], index: 2, kind: input, shape index: {}]   ;;  %s2473_s3 = inlined_call_operand.hbm [shape: f32[2,4,256], index: 3, kind: output, shape index: {}]  }
   0x1   :  { %9 = vsyncpa [#allocation3], 0 }
   0x2   :  { %10 = vsyncpa [#allocation8], 0 }
   0x3   :  { %12 = vsyncpa [#allocation8 + $0x1], 0 }
   0x4   :  { %13 = vsyncpa [#allocation4], 0 }
   0x5   :  { %15 = vsyncpa [#allocation4 + $0x1], 0  ;;  %s1540_s12 = smov 0   ;;  %s1542_s13 = smov 0  }
   0x6   :  { %s1544_s14 = smov 0   ;;  %s1546_s15 = smov 0  }
   0x7   :  { %s1548_s16 = smov 0   ;;  %s1550_s17 = smov 0  }
   0x8 LB: > { %s1178_s18 = sadd.s32 4294967295, %s1514_s17   ;;  %s1179_s19 = sadd.s32 4294967294, %s1514_s17   ;;  %s1514_s17 = sphi %s1550_s17, %s21_s17   ;;  %s1510_s16 = sphi %s1548_s16, %s2504_s16   ;;  %s1506_s15 = sphi %s1546_s15, %s2503_s15   ;;  %s1502_s14 = sphi %s1544_s14, %s2502_s14   ;;  %s1498_s13 = sphi %s1542_s13, %s2501_s13   ;;  %s1494_s12 = sphi %s1540_s12, %s2500_s12  }
   0x9   : > { %p100_p0 = scmp.ne.s32.totalorder %s1498_s13, %s1494_s12  ;;  %p1574_p1 = scmp.eq.s32.totalorder %s1178_s18, 0 }
   0xa   : > { %p1578_p2 = scmp.eq.s32.totalorder %s1178_s18, 1  ;;  %p132_p3 = scmp.eq.s32.totalorder %s1179_s19, 1 }
   0xb   : > { %s2478_s20 = scalar_select %p1574_p1, 1, 0 }
   0xc   : > { %p1584_p4 = por %p1574_p1, %p100_p0  ;;  %p1180_p5 = scmp.ge.s32.totalorder %s1514_s17, 1 }
   0xd   : > { %p1589_p6 = por %p132_p3, %p100_p0  ;;  %p139_p7 = scmp.lt.s32.totalorder %s1514_s17, 3 }
   0xe   : > { %s2480_s22 = scalar_select %p1584_p4, 1, 0 }
   0xf   : > { %s2481_s23 = scalar_select %p1589_p6, 1, 0 }
  0x10   : > { %p1594_p8 = pnand %p1180_p5, %p139_p7  ;;  %s1516_s25 = smov [#allocation6]  }
  0x11   : > { %s164_s26 = sshll.u32 %s1516_s25, 4  ;;  %s33_s28 = sadd.s32 1, %s1510_s16  ;;  %s1601_s26 = int_to_ptr.vmem [resolvable:$true] %s164_s26 }
  0x12   : > { %s2482_s24 = scalar_select %p1594_p8, 1, 0 }
  0x13   : > { %p1281_p10 = pneg %p1594_p8  ;;  %p1612_p12 = scmp.ge.s32.totalorder %s33_s28, 2 }
  0x14   : > { %s1353_s5 = scalar_lea.hbm %s2470_s0, 16 }
  0x15   : > { %p1605_p11 = pnand %p1281_p10, %p1574_p1  ;;  %p1354_p13 = scmp.ne.s32.totalorder %s2470_s0, %s1353_s5 }
  0x16   : > { %p1360_p7 = scmp.lt.u32.totalorder %s1353_s5, %s2470_s0 }
  0x17   : > { %p1355_p0 = pneg %p1605_p11 }
  0x19   : > { %p1356_p3 = pnand %p1355_p0, %p1354_p13 }
  0x1b   : > { %p1357_p5 = pneg %p1356_p3 }
  0x1d   : > { %p1362_p10 = pnand %p1360_p7, %p1357_p5 }
  0x1f   : > { %1365 = shalt.err (!%p1362_p10)
}
  0x20   : > { %s1517_s10 = smov [#allocation2]   ;;  %s1366_s30 = scalar_lea.hbm %s2471_s1, 64 }
  0x21   : > { %1284 = dma.hbm_to_smem (!%p1605_p11), %s2470_s0, 16, %s1517_s10, [#allocation5]  }
  0x22   : > { %p1367_p13 = scmp.ne.s32.totalorder %s2471_s1, %s1366_s30  ;;  %p1373_p7 = scmp.lt.u32.totalorder %s1366_s30, %s2471_s1 }
  0x24   : > { %p1369_p3 = pnand %p1367_p13, %p1355_p0 }
  0x26   : > { %p1370_p5 = pneg %p1369_p3 }
  0x28   : > { %p1375_p10 = pnand %p1373_p7, %p1370_p5 }
  0x2a   : > { %1378 = shalt.err (!%p1375_p10)
}
  0x2b   : > { %s1379_s8 = scalar_lea.vmem %s1601_s26, 64  ;;  %p1387_p1 = scmp.lt.s32.totalorder %s1601_s26, %s1601_s26 }
  0x2c   : > { %p1380_p9 = scmp.ne.s32.totalorder %s1601_s26, %s1379_s8  ;;  %p1388_p13 = scmp.lt.s32.totalorder %s1379_s8, %s1379_s8 }
  0x2e   : > { %p1382_p6 = pnand %p1380_p9, %p1355_p0  ;;  %p1389_p3 = por %p1388_p13, %p1387_p1 }
  0x30   : > { %p1383_p4 = pneg %p1382_p6 }
  0x32   : > { %p1390_p8 = pnand %p1389_p3, %p1383_p4 }
  0x34   : > { %1393 = shalt.err (!%p1390_p8)
}
  0x35   : > { %1287 = dma.hbm_to_vmem [thread:$0]  (!%p1605_p11), %s2471_s1, 64, %s1601_s26, [#allocation3]  }
  0x36   : > { %s2506_s28 = smov (%p1612_p12, %s33_s28), 0  ;;  %s87_s27 = sadd.s32 1, %s1502_s14 }
  0x37   : > { %p94_p1 = scmp.ne.s32.totalorder %s1502_s14, %s1498_s13  ;;  %s84_s11 = ssub.s32 %s1510_s16, %s2506_s28 }
  0x38   : > { %p95_p4 = scmp.eq.s32.totalorder %s1514_s17, 0  ;;  %p85_p6 = scmp.eq.s32.totalorder %s84_s11, 0 }
  0x39   : > { %p1674_p8 = por %p1578_p2, %p94_p1  ;;  %p1298_p0 = scmp.lt.s32.totalorder %s1514_s17, 2 }
  0x3a   : > { %p96_p9 = por %p95_p4, %p94_p1  ;;  %s175_s26 = sand.u32 1, %s1502_s14  }
  0x3b   : > { %s1680_s19 = scalar_select %p85_p6, %s1502_s14, %s87_s27  }
  0x3c   : > { %s1199_s25 = sshll.u32 %s1510_s16, 7  ;;  %s1184_s29 = sshll.u32 %s175_s26, 3 }
  0x3d   : > { %s1687_s6 = scalar_lea.hbm %s2472_s2, %s1199_s25  ;;  %s179_s21 = scalar_lea.vmem [#allocation7], %s1184_s29 }
  0x3e   : > { %s187_s5 = sshll.u32 %s179_s21, 4  ;;  %p1689_p2 = pnand %p1298_p0, %p96_p9  ;;  %s1693_s5 = int_to_ptr.vmem [resolvable:$true] %s187_s5 }
  0x3f   : > { %s176_s8 = scalar_lea.sflag [#allocation8], %s175_s26  ;;  %s1394_s9 = scalar_lea.hbm %s1687_s6, 128 }
  0x40   : > { %p1395_p11 = scmp.ne.s32.totalorder %s1687_s6, %s1394_s9  ;;  %p1396_p12 = pneg %p1689_p2 }
  0x41   : > { %s1399_s11 = scalar_lea.hbm %s2472_s2, 256  ;;  %p1400_p10 = scmp.lt.u32.totalorder %s1687_s6, %s2472_s2 }
  0x42   : > { %p1397_p5 = pnand %p1396_p12, %p1395_p11  ;;  %p1401_p13 = scmp.lt.u32.totalorder %s1399_s11, %s1394_s9 }
  0x43   : > { %p1403_p1 = scmp.lt.u32.totalorder %s1394_s9, %s1687_s6 }
  0x44   : > { %p1398_p7 = pneg %p1397_p5  ;;  %p1402_p3 = por %p1401_p13, %p1400_p10 }
  0x46   : > { %p1404_p4 = por %p1403_p1, %p1402_p3 }
  0x48   : > { %p1405_p6 = pnand %p1404_p4, %p1398_p7 }
  0x4a   : > { %1408 = shalt.err (!%p1405_p6)
}
  0x4b   : > { %s1409_s26 = scalar_lea.vmem %s1693_s5, 128  ;;  %s1518_s30 = smov [#allocation7]  }
  0x4c   : > { %p1410_p9 = scmp.ne.s32.totalorder %s1693_s5, %s1409_s26  ;;  %s1414_s4 = sshll.u32 %s1518_s30, 4  ;;  %s1415_s4 = int_to_ptr.vmem [resolvable:$false] %s1414_s4 }
  0x4d   : > { %s1416_s21 = scalar_lea.vmem %s1415_s4, 256  ;;  %p1417_p5 = scmp.lt.s32.totalorder %s1693_s5, %s1415_s4 }
  0x4e   : > { %p1412_p0 = pnand %p1410_p9, %p1396_p12  ;;  %p1418_p10 = scmp.lt.s32.totalorder %s1416_s21, %s1409_s26 }
  0x50   : > { %p1413_p11 = pneg %p1412_p0  ;;  %p1419_p13 = por %p1418_p10, %p1417_p5 }
  0x52   : > { %p1420_p3 = pnand %p1419_p13, %p1413_p11 }
  0x54   : > { %1423 = shalt.err (!%p1420_p3)
}
  0x55   : > { %1291 = dma.hbm_to_vmem [thread:$0]  (!%p1689_p2), %s1687_s6, 128, %s1693_s5, %s176_s8  }
  0x56   : > { %p2487_p7 = scmp.ne.s32.totalorder %s2482_s24, 0 }
  0x57   : > { %p2488_p12 = scmp.ne.s32.totalorder (!%p2487_p7), %s2478_s20, 0 }
  0x58   : > { %196 = sbr.rel (%p2487_p7) target bundleno = 538 (0x21a), region = 32 }
  0x5f   : > { %1477 = dma.done.wait (%p2488_p12), [#allocation5], 16  }
  0x60   : > { %1479 = vsyncadd (%p2488_p12), [#allocation5], 4294967280 }
  0x61   : > { %1481 = dma.done.wait (%p2488_p12), [#allocation3], 64  }
  0x62   : > { %1483 = vsyncadd (%p2488_p12), [#allocation3], 4294967232  ;;  %s1731_s7 = sand.u32 1, %s1498_s13   ;;  %p2489_p2 = scmp.ne.s32.totalorder %s2480_s22, 0 }
  0x63   : > { %s1190_s24 = sshll.u32 %s1731_s7, 3  ;;  %s207_s6 = scalar_lea.sflag [#allocation8], %s1731_s7 }
  0x64   : > { %s1737_s5 = scalar_lea.vmem [#allocation7], %s1190_s24 }
  0x65   : > { %1485 = dma.done.wait (%p2489_p2), %s207_s6, 128  }
  0x66   : > { %1487 = vsyncadd (%p2489_p2), %s207_s6, 4294967168 }
  0x67   : > { %215 = sfence }
  0x68   : > { %s272_s20 = smul.u32 6, %s1506_s15  ;;  %v236_v0 = vld [vmem:[#allocation6] ss:$2 sm:$0x3]  ;;  %v239_v19 = vlaneseq  ;;  %s1200_s22 = sshll.u32 %s1506_s15, 7 }
  0x69   : > { %v238_v1 = vld [vmem:[#allocation6 + $0x1] ss:$2 sm:$0x3]  ;;  %s233_s6 = scalar_lea.vmem [#allocation9], %s1190_s24  ;;  %s1519_s15 = smov [#allocation9]  }
  0x6a   : > { %s273_s8 = sld [smem:[#allocation2 + %s272_s20]]  ;;  %s274_s9 = sadd.s32 1, %s272_s20  ;;  %v1744_v24 = vshrl.u32 %v239_v19, 7 }
  0x6b   : > { %s275_s10 = sld [smem:[#allocation2 + %s274_s9]]  ;;  %s276_s27 = sadd.s32 2, %s272_s20 }
  0x6c   : > { %s277_s11 = sld [smem:[#allocation2 + %s276_s27]]  ;;  %s278_s25 = sadd.s32 3, %s272_s20  ;;  %v1747_v28 = vadd.s32 8, %v1744_v24  ;;  %v1750_v31 = vsub.s32 0, %v1744_v24  ;;  %v1753_v32 = vsub.s32 1, %v1744_v24  ;;  %v1756_v33 = vadd.s32 16, %v1744_v24 }
  0x6d   : > { %s279_s29 = sld [smem:[#allocation2 + %s278_s25]]  ;;  %s280_s26 = sadd.s32 4, %s272_s20  ;;  %v1759_v35 = vadd.s32 24, %v1744_v24  ;;  %v1762_v36 = vadd.s32 32, %v1744_v24  ;;  %v1765_v37 = vadd.s32 40, %v1744_v24  ;;  %v1768_v39 = vadd.s32 48, %v1744_v24 }
  0x6e   : > { %s281_s30 = sld [smem:[#allocation2 + %s280_s26]]  ;;  %s282_s4 = sadd.s32 5, %s272_s20  ;;  %v1771_v40 = vadd.s32 56, %v1744_v24  ;;  %v1774_v41 = vadd.s32 64, %v1744_v24  ;;  %v1777_v44 = vadd.s32 72, %v1744_v24  ;;  %v1780_v45 = vadd.s32 80, %v1744_v24 }
  0x6f   : > { %s283_s21 = sld [smem:[#allocation2 + %s282_s4]]  ;;  %v1783_v47 = vadd.s32 88, %v1744_v24  ;;  %v1786_v48 = vadd.s32 96, %v1744_v24  ;;  %v1789_v49 = vadd.s32 104, %v1744_v24  ;;  %v1792_v52 = vadd.s32 112, %v1744_v24  ;;  %s2421_s9 = scalar_lea.hbm %s2473_s3, %s1200_s22 }
  0x70   : > { %v284_v2 = vstv %s273_s8  ;;  %v1795_v53 = vadd.s32 120, %v1744_v24  ;;  %v1798_v55 = vadd.s32 128, %v1744_v24  ;;  %v1801_v59 = vadd.s32 136, %v1744_v24  ;;  %s1428_s24 = sshll.u32 %s1519_s15, 4  ;;  %s1429_s24 = int_to_ptr.vmem [resolvable:$false] %s1428_s24 }
  0x71   : > { %v285_v3 = vmul.f32 %v284_v2, %v236_v0  ;;  %v286_v4 = vstv %s275_s10  ;;  %v1808_v61 = vadd.s32 144, %v1744_v24  ;;  %v1811_v62 = vadd.s32 152, %v1744_v24  ;;  %s1055_s10 = scalar_lea.sflag [#allocation4], %s1731_s7 }
  0x72   : > { %v287_v5 = vmul.f32 %v286_v4, %v238_v1  ;;  %v289_v6 = vstv %s277_s11  ;;  %s1430_s11 = scalar_lea.vmem %s1429_s24, 256 }
  0x73   : > { %v291_v7 = vstv %s279_s29 }
  0x74   : > { %v288_v8 = vadd.f32 %v287_v5, %v285_v3  ;;  %v292_v9 = vmul.f32 %v291_v7, %v236_v0  ;;  %v293_v10 = vstv %s281_s30  ;;  %v1822_v5 = vadd.s32 160, %v1744_v24 }
  0x75   : > { %v294_v11 = vmul.f32 %v293_v10, %v238_v1  ;;  %v296_v13 = vstv %s283_s21 }
  0x76   : > { %v290_v12 = vadd.f32 %v289_v6, %v288_v8  ;;  %v1825_v6 = vadd.s32 168, %v1744_v24  ;;  %v1832_v8 = vadd.s32 176, %v1744_v24 }
  0x77   : > { %v295_v14 = vadd.f32 %v294_v11, %v292_v9 }
  0x78   : > { %v298_v15 = vadd.f32 1.0, %v290_v12 }
  0x79   : > { %v297_v16 = vadd.f32 %v296_v13, %v295_v14  ;;  %v1839_v13 = vadd.s32 184, %v1744_v24  ;;  %v1846_v14 = vadd.s32 192, %v1744_v24 }
  0x7a   : > { %v299_v17 = vmul.f32 16.0, %v298_v15  ;;  %v1849_v15 = vadd.s32 200, %v1744_v24 }
  0x7b   : > { %v302_v18 = vadd.f32 1.0, %v297_v16  ;;  %v1852_v16 = vadd.s32 208, %v1744_v24 }
  0x7c   : > { %v1192_v20 = vadd.f32 -1.0, %v299_v17  ;;  %v1855_v17 = vadd.s32 216, %v1744_v24 }
  0x7d   : > { %v303_v21 = vmul.f32 16.0, %v302_v18 }
  0x7e   : > { %v301_v22 = vmul.f32 0.5, %v1192_v20 }
  0x7f   : > { %v1193_v23 = vadd.f32 -1.0, %v303_v21 }
  0x80   : > { %v306_v25 = vmax.f32 %v301_v22, -2.0 }
  0x81   : > { %v305_v26 = vmul.f32 0.5, %v1193_v23 }
  0x82   : > { %v307_v27 = vmin.f32 %v306_v25, 17.0 }
  0x83   : > { %v308_v29 = vmax.f32 %v305_v26, -2.0 }
  0x84   : > { %v310_v30 = vfloor.f32 %v307_v27 }
  0x85   : > { %v309_v34 = vmin.f32 %v308_v29, 17.0 }
  0x86   : > { %v1265_v38 = vtrunc.f32 %v310_v30  ;;  %v314_v43 = vsub.f32 %v307_v27, %v310_v30 }
  0x87   : > { %v311_v42 = vfloor.f32 %v309_v34 }
  0x88   : > { %v1266_v46 = vcvt.f32.s32 %v1265_v38  ;;  %v315_v57 = vsub.f32 1.0, %v314_v43 }
  0x89   : > { %v1267_v50 = vtrunc.f32 %v311_v42  ;;  %v316_v51 = vsub.f32 %v309_v34, %v311_v42 }
  0x8a   : > { %vm318_vm0 = vcmp.ge.s32.totalorder %v1266_v46, 0  ;;  %vm319_vm1 = vcmp.lt.s32.totalorder %v1266_v46, 16  ;;  %v321_v54 = vadd.s32 1, %v1266_v46 }
  0x8b   : > { %v1268_v56 = vcvt.f32.s32 %v1267_v50  ;;  %v317_v58 = vsub.f32 1.0, %v316_v51  ;;  %vm1803_vm2 = vmand %vm318_vm0, %vm319_vm1  ;;  %v339_v7 = vmul.f32 %v316_v51, %v315_v57  ;;  %v342_v11 = vmul.f32 %v316_v51, %v314_v43 }
  0x8c   : > { %vm322_vm3 = vcmp.ge.s32.totalorder %v321_v54, 0  ;;  %vm323_vm4 = vcmp.lt.s32.totalorder %v321_v54, 16 }
  0x8d   : > { %vm1813_vm5 = vmand %vm322_vm3, %vm323_vm4  ;;  %vm325_vm6 = vcmp.ge.s32.totalorder %v1268_v56, 0  ;;  %vm326_vm7 = vcmp.lt.s32.totalorder %v1268_v56, 16  ;;  %v328_v0 = vadd.s32 1, %v1268_v56  ;;  %v333_v1 = vmul.f32 %v317_v58, %v315_v57 }
  0x8e   : > { %vm1817_vm8 = vmand %vm325_vm6, %vm326_vm7  ;;  %v336_v3 = vmul.f32 %v317_v58, %v314_v43  ;;  %v344_v4 = vmul.u32 16, %v1268_v56 }
  0x8f   : > { %vm329_vm9 = vcmp.ge.s32.totalorder %v328_v0, 0  ;;  %vm330_vm10 = vcmp.lt.s32.totalorder %v328_v0, 16  ;;  %vm332_vm11 = vmand %vm1817_vm8, %vm1803_vm2 }
  0x90   : > { %vm1834_vm12 = vmand %vm329_vm9, %vm330_vm10  ;;  %v334_v10 = vsel %vm332_vm11, %v333_v1, 0.0  ;;  %v345_v12 = vadd.s32 %v1266_v46, %v344_v4 }
  0x91   : > { %vm335_vm13 = vmand %vm1817_vm8, %vm1813_vm5  ;;  %v1865_v20 = vrot.slane %v334_v10, %v1753_v32  ;;  %v1881_v26 = vrot.slane %v334_v10, %v1750_v31 }
  0x92   : > { %v337_v18 = vsel %vm335_vm13, %v336_v3, 0.0  ;;  %vm338_vm14 = vmand %vm1834_vm12, %vm1803_vm2  ;;  %v1862_v19 = vrot.slane %v345_v12, %v1753_v32  ;;  %v1868_v21 = vrot.slane %v345_v12, %v1750_v31 }
  0x93   : > { %v340_v22 = vsel %vm338_vm14, %v339_v7, 0.0  ;;  %vm341_vm15 = vmand %vm1834_vm12, %vm1813_vm5  ;;  %v1875_v23 = vrot.slane %v337_v18, %v1753_v32  ;;  %v1878_v25 = vrot.slane %v337_v18, %v1750_v31 }
  0x94   : > { %v343_v27 = vsel %vm341_vm15, %v342_v11, 0.0  ;;  %v355_v29 = vsub.s32 %v1744_v24, %v1862_v19  ;;  %v357_v30 = vsub.s32 %v1747_v28, %v1862_v19  ;;  %v1888_v34 = vrot.slane %v340_v22, %v1753_v32 }
  0x95   : > { %v1891_v38 = vrot.slane %v343_v27, %v1750_v31  ;;  %v1894_v42 = vrot.slane %v343_v27, %v1753_v32  ;;  %v354_v43 = vsub.s32 %v1744_v24, %v1868_v21  ;;  %v356_v46 = vsub.s32 %v1747_v28, %v1868_v21 }
  0x96   : > { %vm419_vm0 = vcmp.eq.s32.totalorder %v355_v29, 0  ;;  %vm421_vm1 = vcmp.eq.s32.totalorder %v357_v30, 0  ;;  %vm483_vm2 = vcmp.eq.s32.totalorder %v355_v29, 1  ;;  %vm485_vm3 = vcmp.eq.s32.totalorder %v357_v30, 1 }
  0x97   : > { %vm547_vm4 = vcmp.eq.s32.totalorder %v355_v29, 16  ;;  %vm549_vm5 = vcmp.eq.s32.totalorder %v357_v30, 16  ;;  %vm611_vm6 = vcmp.eq.s32.totalorder %v355_v29, 17  ;;  %vm613_vm7 = vcmp.eq.s32.totalorder %v357_v30, 17 }
  0x98   : > { %v686_v50 = vsel %vm611_vm6, %v1894_v42, 0.0  ;;  %v688_v51 = vsel %vm613_vm7, %v1894_v42, 0.0  ;;  %vm418_vm8 = vcmp.eq.s32.totalorder %v354_v43, 0  ;;  %vm420_vm9 = vcmp.eq.s32.totalorder %v356_v46, 0 }
  0x99   : > { %v761_v32 = vsel %vm547_vm4, %v1888_v34, %v686_v50  ;;  %v763_v54 = vsel %vm549_vm5, %v1888_v34, %v688_v51  ;;  %vm482_vm10 = vcmp.eq.s32.totalorder %v354_v43, 1  ;;  %vm484_vm11 = vcmp.eq.s32.totalorder %v356_v46, 1 }
  0x9a   : > { %v836_v28 = vsel %vm483_vm2, %v1875_v23, %v761_v32  ;;  %v838_v56 = vsel %vm485_vm3, %v1875_v23, %v763_v54  ;;  %vm546_vm12 = vcmp.eq.s32.totalorder %v354_v43, 16  ;;  %vm548_vm13 = vcmp.eq.s32.totalorder %v356_v46, 16 }
  0x9b   : > { %v911_v57 = vsel %vm419_vm0, %v1865_v20, %v836_v28  ;;  %v913_v58 = vsel %vm421_vm1, %v1865_v20, %v838_v56  ;;  %vm610_vm14 = vcmp.eq.s32.totalorder %v354_v43, 17  ;;  %vm612_vm15 = vcmp.eq.s32.totalorder %v356_v46, 17 }
  0x9c   : > { %v1201_v60 = vpack.c.bf16 %v913_v58, %v911_v57  ;;  %v685_v63 = vsel %vm610_vm14, %v1891_v38, 0.0  ;;  %v687_v0 = vsel %vm612_vm15, %v1891_v38, 0.0  ;;  %v1913_v1 = vrot.slane %v340_v22, %v1750_v31 }
  0x9d   : > { %v359_v2 = vsub.s32 %v1756_v33, %v1862_v19  ;;  %v361_v3 = vsub.s32 %v1759_v35, %v1862_v19  ;;  %v358_v4 = vsub.s32 %v1756_v33, %v1868_v21  ;;  %v360_v7 = vsub.s32 %v1759_v35, %v1868_v21 }
  0x9e   : > { %1202 = vmatprep.subr.bf16.mxu0 %v1201_v60  ;;  %v760_v9 = vsel %vm546_vm12, %v1913_v1, %v685_v63  ;;  %v762_v10 = vsel %vm548_vm13, %v1913_v1, %v687_v0  ;;  %v1927_v31 = vsub.s32 %v1762_v36, %v1862_v19  ;;  %v1931_v11 = vsub.s32 %v1765_v37, %v1862_v19 }
  0x9f   : > { %v835_v12 = vsel %vm482_vm10, %v1878_v25, %v760_v9  ;;  %v837_v33 = vsel %vm484_vm11, %v1878_v25, %v762_v10  ;;  %vm423_vm0 = vcmp.eq.s32.totalorder %v359_v2, 0  ;;  %vm425_vm1 = vcmp.eq.s32.totalorder %v361_v3, 0 }
  0xa0   : > { %v910_v35 = vsel %vm418_vm8, %v1881_v26, %v835_v12  ;;  %v912_v18 = vsel %vm420_vm9, %v1881_v26, %v837_v33  ;;  %vm487_vm2 = vcmp.eq.s32.totalorder %v359_v2, 1  ;;  %vm489_vm3 = vcmp.eq.s32.totalorder %v361_v3, 1 }
  0xa1   : > { %v1203_v22 = vpack.c.bf16 %v912_v18, %v910_v35  ;;  %vm551_vm4 = vcmp.eq.s32.totalorder %v359_v2, 16  ;;  %vm553_vm5 = vcmp.eq.s32.totalorder %v361_v3, 16  ;;  %vm615_vm6 = vcmp.eq.s32.totalorder %v359_v2, 17 }
  0xa2   : > { %vm617_vm7 = vcmp.eq.s32.totalorder %v361_v3, 17  ;;  %v690_v27 = vsel %vm615_vm6, %v1894_v42, 0.0  ;;  %vm422_vm10 = vcmp.eq.s32.totalorder %v358_v4, 0  ;;  %vm424_vm12 = vcmp.eq.s32.totalorder %v360_v7, 0 }
  0xa3   : > { %1204 = vmatpush1.bf16.msra.mxu0 %v1203_v22  ;;  %v692_v29 = vsel %vm617_vm7, %v1894_v42, 0.0  ;;  %v765_v30 = vsel %vm551_vm4, %v1888_v34, %v690_v27  ;;  %vm486_vm8 = vcmp.eq.s32.totalorder %v358_v4, 1  ;;  %vm488_vm11 = vcmp.eq.s32.totalorder %v360_v7, 1 }
  0xa4   : > { %v767_v43 = vsel %vm553_vm5, %v1888_v34, %v692_v29  ;;  %v840_v46 = vsel %vm487_vm2, %v1875_v23, %v765_v30  ;;  %vm550_vm9 = vcmp.eq.s32.totalorder %v358_v4, 16  ;;  %vm552_vm13 = vcmp.eq.s32.totalorder %v360_v7, 16 }
  0xa5   : > { %v842_v50 = vsel %vm489_vm3, %v1875_v23, %v767_v43  ;;  %v915_v51 = vsel %vm423_vm0, %v1865_v20, %v840_v46  ;;  %vm614_vm14 = vcmp.eq.s32.totalorder %v358_v4, 17  ;;  %vm616_vm15 = vcmp.eq.s32.totalorder %v360_v7, 17 }
  0xa6   : > { %v917_v32 = vsel %vm425_vm1, %v1865_v20, %v842_v50  ;;  %v689_v54 = vsel %vm614_vm14, %v1891_v38, 0.0  ;;  %v691_v28 = vsel %vm616_vm15, %v1891_v38, 0.0  ;;  %vm427_vm4 = vcmp.eq.s32.totalorder %v1927_v31, 0 }
  0xa7   : > { %v1205_v56 = vpack.c.bf16 %v917_v32, %v915_v51  ;;  %v764_v57 = vsel %vm550_vm9, %v1913_v1, %v689_v54  ;;  %v766_v58 = vsel %vm552_vm13, %v1913_v1, %v691_v28  ;;  %vm429_vm2 = vcmp.eq.s32.totalorder %v1931_v11, 0 }
  0xa8   : > { %v839_v60 = vsel %vm486_vm8, %v1878_v25, %v764_v57  ;;  %v841_v63 = vsel %vm488_vm11, %v1878_v25, %v766_v58  ;;  %vm491_vm0 = vcmp.eq.s32.totalorder %v1927_v31, 1  ;;  %vm493_vm1 = vcmp.eq.s32.totalorder %v1931_v11, 1 }
  0xa9   : > { %1206 = vmatprep.subr.bf16.mxu0 %v1205_v56  ;;  %v914_v0 = vsel %vm422_vm10, %v1881_v26, %v839_v60  ;;  %v916_v2 = vsel %vm424_vm12, %v1881_v26, %v841_v63  ;;  %vm555_vm3 = vcmp.eq.s32.totalorder %v1927_v31, 16  ;;  %vm557_vm5 = vcmp.eq.s32.totalorder %v1931_v11, 16 }
  0xaa   : > { %v1207_v3 = vpack.c.bf16 %v916_v2, %v914_v0  ;;  %vm619_vm6 = vcmp.eq.s32.totalorder %v1927_v31, 17  ;;  %vm621_vm7 = vcmp.eq.s32.totalorder %v1931_v11, 17  ;;  %v362_v9 = vsub.s32 %v1762_v36, %v1868_v21 }
  0xab   : > { %v694_v10 = vsel %vm619_vm6, %v1894_v42, 0.0  ;;  %v696_v4 = vsel %vm621_vm7, %v1894_v42, 0.0  ;;  %v364_v7 = vsub.s32 %v1765_v37, %v1868_v21  ;;  %v367_v12 = vsub.s32 %v1768_v39, %v1862_v19 }
  0xac   : > { %1208 = vmatpush1.bf16.msra.mxu0 %v1207_v3  ;;  %v769_v33 = vsel %vm555_vm3, %v1888_v34, %v694_v10  ;;  %v771_v35 = vsel %vm557_vm5, %v1888_v34, %v696_v4  ;;  %vm426_vm10 = vcmp.eq.s32.totalorder %v362_v9, 0  ;;  %vm490_vm12 = vcmp.eq.s32.totalorder %v362_v9, 1 }
  0xad   : > { %v844_v36 = vsel %vm491_vm0, %v1875_v23, %v769_v33  ;;  %v846_v18 = vsel %vm493_vm1, %v1875_v23, %v771_v35  ;;  %vm428_vm8 = vcmp.eq.s32.totalorder %v364_v7, 0  ;;  %vm492_vm11 = vcmp.eq.s32.totalorder %v364_v7, 1 }
  0xae   : > { %v919_v37 = vsel %vm427_vm4, %v1865_v20, %v844_v36  ;;  %v921_v22 = vsel %vm429_vm2, %v1865_v20, %v846_v18  ;;  %vm554_vm9 = vcmp.eq.s32.totalorder %v362_v9, 16  ;;  %vm556_vm13 = vcmp.eq.s32.totalorder %v364_v7, 16 }
  0xaf   : > { %v1209_v27 = vpack.c.bf16 %v921_v22, %v919_v37  ;;  %vm618_vm14 = vcmp.eq.s32.totalorder %v362_v9, 17  ;;  %vm620_vm15 = vcmp.eq.s32.totalorder %v364_v7, 17  ;;  %v369_v29 = vsub.s32 %v1771_v40, %v1862_v19 }
  0xb0   : > { %v693_v30 = vsel %vm618_vm14, %v1891_v38, 0.0  ;;  %v695_v43 = vsel %vm620_vm15, %v1891_v38, 0.0  ;;  %vm431_vm0 = vcmp.eq.s32.totalorder %v367_v12, 0  ;;  %vm495_vm1 = vcmp.eq.s32.totalorder %v367_v12, 1 }
  0xb1   : > { %1210 = vmatprep.subr.bf16.mxu0 %v1209_v27  ;;  %v768_v31 = vsel %vm554_vm9, %v1913_v1, %v693_v30  ;;  %v770_v11 = vsel %vm556_vm13, %v1913_v1, %v695_v43  ;;  %vm433_vm4 = vcmp.eq.s32.totalorder %v369_v29, 0  ;;  %vm497_vm2 = vcmp.eq.s32.totalorder %v369_v29, 1 }
  0xb2   : > { %v843_v46 = vsel %vm490_vm12, %v1878_v25, %v768_v31  ;;  %v845_v50 = vsel %vm492_vm11, %v1878_v25, %v770_v11  ;;  %vm559_vm3 = vcmp.eq.s32.totalorder %v367_v12, 16  ;;  %vm561_vm5 = vcmp.eq.s32.totalorder %v369_v29, 16 }
  0xb3   : > { %v918_v51 = vsel %vm426_vm10, %v1881_v26, %v843_v46  ;;  %v920_v32 = vsel %vm428_vm8, %v1881_v26, %v845_v50  ;;  %vm623_vm6 = vcmp.eq.s32.totalorder %v367_v12, 17  ;;  %vm625_vm7 = vcmp.eq.s32.totalorder %v369_v29, 17 }
  0xb4   : > { %v1211_v54 = vpack.c.bf16 %v920_v32, %v918_v51  ;;  %v698_v28 = vsel %vm623_vm6, %v1894_v42, 0.0  ;;  %v700_v56 = vsel %vm625_vm7, %v1894_v42, 0.0  ;;  %v366_v57 = vsub.s32 %v1768_v39, %v1868_v21 }
  0xb5   : > { %v773_v58 = vsel %vm559_vm3, %v1888_v34, %v698_v28  ;;  %v775_v60 = vsel %vm561_vm5, %v1888_v34, %v700_v56  ;;  %v368_v63 = vsub.s32 %v1771_v40, %v1868_v21  ;;  %v371_v0 = vsub.s32 %v1774_v41, %v1862_v19 }
  0xb6   : > { %1212 = vmatpush1.bf16.msra.mxu0 %v1211_v54  ;;  %v848_v2 = vsel %vm495_vm1, %v1875_v23, %v773_v58  ;;  %v850_v3 = vsel %vm497_vm2, %v1875_v23, %v775_v60  ;;  %vm430_vm10 = vcmp.eq.s32.totalorder %v366_v57, 0  ;;  %vm494_vm12 = vcmp.eq.s32.totalorder %v366_v57, 1 }
  0xb7   : > { %v923_v39 = vsel %vm431_vm0, %v1865_v20, %v848_v2  ;;  %v925_v9 = vsel %vm433_vm4, %v1865_v20, %v850_v3  ;;  %vm432_vm8 = vcmp.eq.s32.totalorder %v368_v63, 0  ;;  %vm496_vm11 = vcmp.eq.s32.totalorder %v368_v63, 1 }
  0xb8   : > { %v1213_v40 = vpack.c.bf16 %v925_v9, %v923_v39  ;;  %vm558_vm9 = vcmp.eq.s32.totalorder %v366_v57, 16  ;;  %vm560_vm13 = vcmp.eq.s32.totalorder %v368_v63, 16  ;;  %vm622_vm14 = vcmp.eq.s32.totalorder %v366_v57, 17 }
  0xb9   : > { %vm624_vm15 = vcmp.eq.s32.totalorder %v368_v63, 17  ;;  %v697_v10 = vsel %vm622_vm14, %v1891_v38, 0.0  ;;  %v373_v4 = vsub.s32 %v1777_v44, %v1862_v19  ;;  %vm435_vm1 = vcmp.eq.s32.totalorder %v371_v0, 0 }
  0xba   : > { %1214 = vmatprep.subr.bf16.mxu0 %v1213_v40  ;;  %v699_v7 = vsel %vm624_vm15, %v1891_v38, 0.0  ;;  %v772_v12 = vsel %vm558_vm9, %v1913_v1, %v697_v10  ;;  %vm499_vm0 = vcmp.eq.s32.totalorder %v371_v0, 1  ;;  %vm563_vm4 = vcmp.eq.s32.totalorder %v371_v0, 16 }
  0xbb   : > { %v774_v33 = vsel %vm560_vm13, %v1913_v1, %v699_v7  ;;  %v847_v35 = vsel %vm494_vm12, %v1878_v25, %v772_v12  ;;  %vm437_vm2 = vcmp.eq.s32.totalorder %v373_v4, 0  ;;  %vm501_vm3 = vcmp.eq.s32.totalorder %v373_v4, 1 }
  0xbc   : > { %v849_v36 = vsel %vm496_vm11, %v1878_v25, %v774_v33  ;;  %v922_v18 = vsel %vm430_vm10, %v1881_v26, %v847_v35  ;;  %vm565_vm5 = vcmp.eq.s32.totalorder %v373_v4, 16  ;;  %vm627_vm6 = vcmp.eq.s32.totalorder %v371_v0, 17 }
  0xbd   : > { %v924_v37 = vsel %vm432_vm8, %v1881_v26, %v849_v36  ;;  %vm629_vm7 = vcmp.eq.s32.totalorder %v373_v4, 17  ;;  %v702_v22 = vsel %vm627_vm6, %v1894_v42, 0.0  ;;  %v370_v27 = vsub.s32 %v1774_v41, %v1868_v21 }
  0xbe   : > { %v1215_v29 = vpack.c.bf16 %v924_v37, %v922_v18  ;;  %v704_v30 = vsel %vm629_vm7, %v1894_v42, 0.0  ;;  %v777_v43 = vsel %vm563_vm4, %v1888_v34, %v702_v22  ;;  %v372_v31 = vsub.s32 %v1777_v44, %v1868_v21 }
  0xbf   : > { %v779_v11 = vsel %vm565_vm5, %v1888_v34, %v704_v30  ;;  %v852_v46 = vsel %vm499_vm0, %v1875_v23, %v777_v43  ;;  %vm434_vm10 = vcmp.eq.s32.totalorder %v370_v27, 0  ;;  %vm498_vm12 = vcmp.eq.s32.totalorder %v370_v27, 1 }
  0xc0   : > { %1216 = vmatpush1.bf16.msra.mxu0 %v1215_v29  ;;  %v854_v50 = vsel %vm501_vm3, %v1875_v23, %v779_v11  ;;  %v927_v41 = vsel %vm435_vm1, %v1865_v20, %v852_v46  ;;  %vm436_vm8 = vcmp.eq.s32.totalorder %v372_v31, 0  ;;  %vm500_vm11 = vcmp.eq.s32.totalorder %v372_v31, 1 }
  0xc1   : > { %v929_v51 = vsel %vm437_vm2, %v1865_v20, %v854_v50  ;;  %vm562_vm9 = vcmp.eq.s32.totalorder %v370_v27, 16  ;;  %vm564_vm13 = vcmp.eq.s32.totalorder %v372_v31, 16  ;;  %vm626_vm14 = vcmp.eq.s32.totalorder %v370_v27, 17 }
  0xc2   : > { %v1217_v44 = vpack.c.bf16 %v929_v51, %v927_v41  ;;  %vm628_vm15 = vcmp.eq.s32.totalorder %v372_v31, 17  ;;  %v701_v32 = vsel %vm626_vm14, %v1891_v38, 0.0  ;;  %v375_v54 = vsub.s32 %v1780_v45, %v1862_v19 }
  0xc3   : > { %v703_v28 = vsel %vm628_vm15, %v1891_v38, 0.0  ;;  %v776_v56 = vsel %vm562_vm9, %v1913_v1, %v701_v32  ;;  %v377_v57 = vsub.s32 %v1783_v47, %v1862_v19  ;;  %v374_v58 = vsub.s32 %v1780_v45, %v1868_v21 }
  0xc4   : > { %1218 = vmatprep.subr.bf16.mxu0 %v1217_v44  ;;  %v778_v60 = vsel %vm564_vm13, %v1913_v1, %v703_v28  ;;  %v851_v63 = vsel %vm498_vm12, %v1878_v25, %v776_v56  ;;  %vm439_vm1 = vcmp.eq.s32.totalorder %v375_v54, 0  ;;  %vm503_vm0 = vcmp.eq.s32.totalorder %v375_v54, 1 }
  0xc5   : > { %v853_v0 = vsel %vm500_vm11, %v1878_v25, %v778_v60  ;;  %v926_v2 = vsel %vm434_vm10, %v1881_v26, %v851_v63  ;;  %vm441_vm4 = vcmp.eq.s32.totalorder %v377_v57, 0  ;;  %vm505_vm2 = vcmp.eq.s32.totalorder %v377_v57, 1 }
  0xc6   : > { %v928_v3 = vsel %vm436_vm8, %v1881_v26, %v853_v0  ;;  %vm567_vm3 = vcmp.eq.s32.totalorder %v375_v54, 16  ;;  %vm569_vm5 = vcmp.eq.s32.totalorder %v377_v57, 16  ;;  %vm631_vm6 = vcmp.eq.s32.totalorder %v375_v54, 17 }
  0xc7   : > { %v1219_v45 = vpack.c.bf16 %v928_v3, %v926_v2  ;;  %vm633_vm7 = vcmp.eq.s32.totalorder %v377_v57, 17  ;;  %v706_v39 = vsel %vm631_vm6, %v1894_v42, 0.0  ;;  %v376_v9 = vsub.s32 %v1783_v47, %v1868_v21 }
  0xc8   : > { %v708_v40 = vsel %vm633_vm7, %v1894_v42, 0.0  ;;  %v781_v10 = vsel %vm567_vm3, %v1888_v34, %v706_v39  ;;  %vm438_vm10 = vcmp.eq.s32.totalorder %v374_v58, 0  ;;  %vm502_vm12 = vcmp.eq.s32.totalorder %v374_v58, 1 }
  0xc9   : > { %1220 = vmatpush1.bf16.msra.mxu0 %v1219_v45  ;;  %v783_v4 = vsel %vm569_vm5, %v1888_v34, %v708_v40  ;;  %v856_v7 = vsel %vm503_vm0, %v1875_v23, %v781_v10  ;;  %vm440_vm8 = vcmp.eq.s32.totalorder %v376_v9, 0  ;;  %vm504_vm11 = vcmp.eq.s32.totalorder %v376_v9, 1 }
  0xca   : > { %v858_v12 = vsel %vm505_vm2, %v1875_v23, %v783_v4  ;;  %v931_v47 = vsel %vm439_vm1, %v1865_v20, %v856_v7  ;;  %vm566_vm9 = vcmp.eq.s32.totalorder %v374_v58, 16  ;;  %vm568_vm13 = vcmp.eq.s32.totalorder %v376_v9, 16 }
  0xcb   : > { %v933_v33 = vsel %vm441_vm4, %v1865_v20, %v858_v12  ;;  %vm630_vm14 = vcmp.eq.s32.totalorder %v374_v58, 17  ;;  %vm632_vm15 = vcmp.eq.s32.totalorder %v376_v9, 17  ;;  %v379_v35 = vsub.s32 %v1786_v48, %v1862_v19 }
  0xcc   : > { %v1221_v36 = vpack.c.bf16 %v933_v33, %v931_v47  ;;  %v705_v18 = vsel %vm630_vm14, %v1891_v38, 0.0  ;;  %v707_v37 = vsel %vm632_vm15, %v1891_v38, 0.0  ;;  %v381_v22 = vsub.s32 %v1789_v49, %v1862_v19 }
  0xcd   : > { %v780_v27 = vsel %vm566_vm9, %v1913_v1, %v705_v18  ;;  %v782_v29 = vsel %vm568_vm13, %v1913_v1, %v707_v37  ;;  %vm443_vm1 = vcmp.eq.s32.totalorder %v379_v35, 0  ;;  %vm507_vm0 = vcmp.eq.s32.totalorder %v379_v35, 1 }
  0xce   : > { %1222 = vmatprep.subr.bf16.mxu0 %v1221_v36  ;;  %v855_v30 = vsel %vm502_vm12, %v1878_v25, %v780_v27  ;;  %v857_v43 = vsel %vm504_vm11, %v1878_v25, %v782_v29  ;;  %vm445_vm4 = vcmp.eq.s32.totalorder %v381_v22, 0  ;;  %vm509_vm2 = vcmp.eq.s32.totalorder %v381_v22, 1 }
  0xcf   : > { %v930_v31 = vsel %vm438_vm10, %v1881_v26, %v855_v30  ;;  %v932_v11 = vsel %vm440_vm8, %v1881_v26, %v857_v43  ;;  %vm571_vm3 = vcmp.eq.s32.totalorder %v379_v35, 16  ;;  %vm573_vm5 = vcmp.eq.s32.totalorder %v381_v22, 16 }
  0xd0   : > { %v1223_v46 = vpack.c.bf16 %v932_v11, %v930_v31  ;;  %vm635_vm6 = vcmp.eq.s32.totalorder %v379_v35, 17  ;;  %vm637_vm7 = vcmp.eq.s32.totalorder %v381_v22, 17  ;;  %v378_v50 = vsub.s32 %v1786_v48, %v1868_v21 }
  0xd1   : > { %v710_v41 = vsel %vm635_vm6, %v1894_v42, 0.0  ;;  %v712_v51 = vsel %vm637_vm7, %v1894_v42, 0.0  ;;  %v380_v44 = vsub.s32 %v1789_v49, %v1868_v21  ;;  %v383_v32 = vsub.s32 %v1792_v52, %v1862_v19 }
  0xd2   : > { %1224 = vmatpush1.bf16.msra.mxu0 %v1223_v46  ;;  %v785_v54 = vsel %vm571_vm3, %v1888_v34, %v710_v41  ;;  %v787_v28 = vsel %vm573_vm5, %v1888_v34, %v712_v51  ;;  %vm442_vm10 = vcmp.eq.s32.totalorder %v378_v50, 0  ;;  %vm506_vm12 = vcmp.eq.s32.totalorder %v378_v50, 1 }
  0xd3   : > { %v860_v48 = vsel %vm507_vm0, %v1875_v23, %v785_v54  ;;  %v862_v56 = vsel %vm509_vm2, %v1875_v23, %v787_v28  ;;  %vm444_vm8 = vcmp.eq.s32.totalorder %v380_v44, 0  ;;  %vm508_vm11 = vcmp.eq.s32.totalorder %v380_v44, 1 }
  0xd4   : > { %v935_v49 = vsel %vm443_vm1, %v1865_v20, %v860_v48  ;;  %v937_v57 = vsel %vm445_vm4, %v1865_v20, %v862_v56  ;;  %vm570_vm9 = vcmp.eq.s32.totalorder %v378_v50, 16  ;;  %vm572_vm13 = vcmp.eq.s32.totalorder %v380_v44, 16 }
  0xd5   : > { %v1225_v58 = vpack.c.bf16 %v937_v57, %v935_v49  ;;  %vm634_vm14 = vcmp.eq.s32.totalorder %v378_v50, 17  ;;  %vm636_vm15 = vcmp.eq.s32.totalorder %v380_v44, 17  ;;  %v385_v60 = vsub.s32 %v1795_v53, %v1862_v19 }
  0xd6   : > { %v709_v63 = vsel %vm634_vm14, %v1891_v38, 0.0  ;;  %v711_v0 = vsel %vm636_vm15, %v1891_v38, 0.0  ;;  %vm447_vm0 = vcmp.eq.s32.totalorder %v383_v32, 0  ;;  %vm511_vm2 = vcmp.eq.s32.totalorder %v383_v32, 1 }
  0xd7   : > { %1226 = vmatprep.subr.bf16.mxu0 %v1225_v58  ;;  %v784_v2 = vsel %vm570_vm9, %v1913_v1, %v709_v63  ;;  %v786_v3 = vsel %vm572_vm13, %v1913_v1, %v711_v0  ;;  %vm449_vm1 = vcmp.eq.s32.totalorder %v385_v60, 0  ;;  %vm513_vm4 = vcmp.eq.s32.totalorder %v385_v60, 1 }
  0xd8   : > { %v859_v45 = vsel %vm506_vm12, %v1878_v25, %v784_v2  ;;  %v861_v39 = vsel %vm508_vm11, %v1878_v25, %v786_v3  ;;  %vm575_vm3 = vcmp.eq.s32.totalorder %v383_v32, 16  ;;  %vm577_vm5 = vcmp.eq.s32.totalorder %v385_v60, 16 }
  0xd9   : > { %v934_v9 = vsel %vm442_vm10, %v1881_v26, %v859_v45  ;;  %v936_v40 = vsel %vm444_vm8, %v1881_v26, %v861_v39  ;;  %vm639_vm6 = vcmp.eq.s32.totalorder %v383_v32, 17  ;;  %vm641_vm7 = vcmp.eq.s32.totalorder %v385_v60, 17 }
  0xda   : > { %v1227_v10 = vpack.c.bf16 %v936_v40, %v934_v9  ;;  %v714_v4 = vsel %vm639_vm6, %v1894_v42, 0.0  ;;  %v716_v7 = vsel %vm641_vm7, %v1894_v42, 0.0  ;;  %v382_v12 = vsub.s32 %v1792_v52, %v1868_v21 }
  0xdb   : > { %v789_v47 = vsel %vm575_vm3, %v1888_v34, %v714_v4  ;;  %v791_v33 = vsel %vm577_vm5, %v1888_v34, %v716_v7  ;;  %v384_v35 = vsub.s32 %v1795_v53, %v1868_v21  ;;  %v387_v36 = vsub.s32 %v1798_v55, %v1862_v19 }
  0xdc   : > { %1228 = vmatpush1.bf16.msra.mxu0 %v1227_v10  ;;  %v864_v18 = vsel %vm511_vm2, %v1875_v23, %v789_v47  ;;  %v866_v37 = vsel %vm513_vm4, %v1875_v23, %v791_v33  ;;  %vm446_vm10 = vcmp.eq.s32.totalorder %v382_v12, 0  ;;  %vm510_vm12 = vcmp.eq.s32.totalorder %v382_v12, 1 }
  0xdd   : > { %v939_v52 = vsel %vm447_vm0, %v1865_v20, %v864_v18  ;;  %v941_v22 = vsel %vm449_vm1, %v1865_v20, %v866_v37  ;;  %vm448_vm8 = vcmp.eq.s32.totalorder %v384_v35, 0  ;;  %vm512_vm11 = vcmp.eq.s32.totalorder %v384_v35, 1 }
  0xde   : > { %v1229_v53 = vpack.c.bf16 %v941_v22, %v939_v52  ;;  %vm574_vm9 = vcmp.eq.s32.totalorder %v382_v12, 16  ;;  %vm576_vm13 = vcmp.eq.s32.totalorder %v384_v35, 16  ;;  %vm638_vm14 = vcmp.eq.s32.totalorder %v382_v12, 17 }
  0xdf   : > { %vm640_vm15 = vcmp.eq.s32.totalorder %v384_v35, 17  ;;  %v713_v27 = vsel %vm638_vm14, %v1891_v38, 0.0  ;;  %v389_v29 = vsub.s32 %v1801_v59, %v1862_v19  ;;  %vm451_vm2 = vcmp.eq.s32.totalorder %v387_v36, 0 }
  0xe0   : > { %1230 = vmatprep.subr.bf16.mxu0 %v1229_v53  ;;  %v715_v30 = vsel %vm640_vm15, %v1891_v38, 0.0  ;;  %v788_v43 = vsel %vm574_vm9, %v1913_v1, %v713_v27  ;;  %vm515_vm0 = vcmp.eq.s32.totalorder %v387_v36, 1  ;;  %vm579_vm1 = vcmp.eq.s32.totalorder %v387_v36, 16 }
  0xe1   : > { %v790_v31 = vsel %vm576_vm13, %v1913_v1, %v715_v30  ;;  %v863_v11 = vsel %vm510_vm12, %v1878_v25, %v788_v43  ;;  %vm453_vm4 = vcmp.eq.s32.totalorder %v389_v29, 0  ;;  %vm517_vm3 = vcmp.eq.s32.totalorder %v389_v29, 1 }
  0xe2   : > { %v865_v46 = vsel %vm512_vm11, %v1878_v25, %v790_v31  ;;  %v938_v50 = vsel %vm446_vm10, %v1881_v26, %v863_v11  ;;  %vm581_vm5 = vcmp.eq.s32.totalorder %v389_v29, 16  ;;  %vm643_vm6 = vcmp.eq.s32.totalorder %v387_v36, 17 }
  0xe3   : > { %v940_v41 = vsel %vm448_vm8, %v1881_v26, %v865_v46  ;;  %vm645_vm7 = vcmp.eq.s32.totalorder %v389_v29, 17  ;;  %v718_v51 = vsel %vm643_vm6, %v1894_v42, 0.0  ;;  %v386_v44 = vsub.s32 %v1798_v55, %v1868_v21 }
  0xe4   : > { %v1231_v32 = vpack.c.bf16 %v940_v41, %v938_v50  ;;  %v720_v54 = vsel %vm645_vm7, %v1894_v42, 0.0  ;;  %v793_v28 = vsel %vm579_vm1, %v1888_v34, %v718_v51  ;;  %v388_v48 = vsub.s32 %v1801_v59, %v1868_v21 }
  0xe5   : > { %v795_v56 = vsel %vm581_vm5, %v1888_v34, %v720_v54  ;;  %v868_v49 = vsel %vm515_vm0, %v1875_v23, %v793_v28  ;;  %vm450_vm10 = vcmp.eq.s32.totalorder %v386_v44, 0  ;;  %vm514_vm12 = vcmp.eq.s32.totalorder %v386_v44, 1 }
  0xe6   : > { %1232 = vmatpush1.bf16.msra.mxu0 %v1231_v32  ;;  %v870_v57 = vsel %vm517_vm3, %v1875_v23, %v795_v56  ;;  %v943_v55 = vsel %vm451_vm2, %v1865_v20, %v868_v49  ;;  %vm452_vm8 = vcmp.eq.s32.totalorder %v388_v48, 0  ;;  %vm516_vm11 = vcmp.eq.s32.totalorder %v388_v48, 1 }
  0xe7   : > { %v945_v58 = vsel %vm453_vm4, %v1865_v20, %v870_v57  ;;  %vm578_vm9 = vcmp.eq.s32.totalorder %v386_v44, 16  ;;  %vm580_vm13 = vcmp.eq.s32.totalorder %v388_v48, 16  ;;  %vm642_vm14 = vcmp.eq.s32.totalorder %v386_v44, 17 }
  0xe8   : > { %v1233_v59 = vpack.c.bf16 %v945_v58, %v943_v55  ;;  %vm644_vm15 = vcmp.eq.s32.totalorder %v388_v48, 17  ;;  %v717_v60 = vsel %vm642_vm14, %v1891_v38, 0.0  ;;  %v391_v63 = vsub.s32 %v1808_v61, %v1862_v19 }
  0xe9   : > { %v719_v0 = vsel %vm644_vm15, %v1891_v38, 0.0  ;;  %v792_v2 = vsel %vm578_vm9, %v1913_v1, %v717_v60  ;;  %v393_v3 = vsub.s32 %v1811_v62, %v1862_v19  ;;  %v390_v45 = vsub.s32 %v1808_v61, %v1868_v21 }
  0xea   : > { %1234 = vmatprep.subr.bf16.mxu0 %v1233_v59  ;;  %v794_v39 = vsel %vm580_vm13, %v1913_v1, %v719_v0  ;;  %v867_v9 = vsel %vm514_vm12, %v1878_v25, %v792_v2  ;;  %vm455_vm2 = vcmp.eq.s32.totalorder %v391_v63, 0  ;;  %vm519_vm0 = vcmp.eq.s32.totalorder %v391_v63, 1 }
  0xeb   : > { %v869_v40 = vsel %vm516_vm11, %v1878_v25, %v794_v39  ;;  %v942_v10 = vsel %vm450_vm10, %v1881_v26, %v867_v9  ;;  %vm457_vm1 = vcmp.eq.s32.totalorder %v393_v3, 0  ;;  %vm521_vm4 = vcmp.eq.s32.totalorder %v393_v3, 1 }
  0xec   : > { %v944_v4 = vsel %vm452_vm8, %v1881_v26, %v869_v40  ;;  %vm583_vm3 = vcmp.eq.s32.totalorder %v391_v63, 16  ;;  %vm585_vm5 = vcmp.eq.s32.totalorder %v393_v3, 16  ;;  %vm647_vm6 = vcmp.eq.s32.totalorder %v391_v63, 17 }
  0xed   : > { %v1235_v61 = vpack.c.bf16 %v944_v4, %v942_v10  ;;  %vm649_vm7 = vcmp.eq.s32.totalorder %v393_v3, 17  ;;  %v722_v7 = vsel %vm647_vm6, %v1894_v42, 0.0  ;;  %v392_v12 = vsub.s32 %v1811_v62, %v1868_v21 }
  0xee   : > { %v724_v47 = vsel %vm649_vm7, %v1894_v42, 0.0  ;;  %v797_v33 = vsel %vm583_vm3, %v1888_v34, %v722_v7  ;;  %vm454_vm10 = vcmp.eq.s32.totalorder %v390_v45, 0  ;;  %vm518_vm12 = vcmp.eq.s32.totalorder %v390_v45, 1 }
  0xef   : > { %1236 = vmatpush1.bf16.msra.mxu0 %v1235_v61  ;;  %v799_v35 = vsel %vm585_vm5, %v1888_v34, %v724_v47  ;;  %v872_v36 = vsel %vm519_vm0, %v1875_v23, %v797_v33  ;;  %vm456_vm8 = vcmp.eq.s32.totalorder %v392_v12, 0  ;;  %vm520_vm11 = vcmp.eq.s32.totalorder %v392_v12, 1 }
  0xf0   : > { %v874_v18 = vsel %vm521_vm4, %v1875_v23, %v799_v35  ;;  %v947_v62 = vsel %vm455_vm2, %v1865_v20, %v872_v36  ;;  %vm582_vm9 = vcmp.eq.s32.totalorder %v390_v45, 16  ;;  %vm584_vm13 = vcmp.eq.s32.totalorder %v392_v12, 16 }
  0xf1   : > { %v949_v37 = vsel %vm457_vm1, %v1865_v20, %v874_v18  ;;  %vm646_vm14 = vcmp.eq.s32.totalorder %v390_v45, 17  ;;  %vm648_vm15 = vcmp.eq.s32.totalorder %v392_v12, 17  ;;  %v395_v52 = vsub.s32 %v1822_v5, %v1862_v19 }
  0xf2   : > { %v1237_v22 = vpack.c.bf16 %v949_v37, %v947_v62  ;;  %v721_v53 = vsel %vm646_vm14, %v1891_v38, 0.0  ;;  %v723_v27 = vsel %vm648_vm15, %v1891_v38, 0.0  ;;  %v397_v29 = vsub.s32 %v1825_v6, %v1862_v19 }
  0xf3   : > { %v796_v30 = vsel %vm582_vm9, %v1913_v1, %v721_v53  ;;  %v798_v43 = vsel %vm584_vm13, %v1913_v1, %v723_v27  ;;  %vm459_vm2 = vcmp.eq.s32.totalorder %v395_v52, 0  ;;  %vm523_vm0 = vcmp.eq.s32.totalorder %v395_v52, 1 }
  0xf4   : > { %1238 = vmatprep.subr.bf16.mxu0 %v1237_v22  ;;  %v871_v31 = vsel %vm518_vm12, %v1878_v25, %v796_v30  ;;  %v873_v11 = vsel %vm520_vm11, %v1878_v25, %v798_v43  ;;  %vm461_vm1 = vcmp.eq.s32.totalorder %v397_v29, 0  ;;  %vm525_vm4 = vcmp.eq.s32.totalorder %v397_v29, 1 }
  0xf5   : > { %v946_v46 = vsel %vm454_vm10, %v1881_v26, %v871_v31  ;;  %v948_v50 = vsel %vm456_vm8, %v1881_v26, %v873_v11  ;;  %vm587_vm3 = vcmp.eq.s32.totalorder %v395_v52, 16  ;;  %vm589_vm5 = vcmp.eq.s32.totalorder %v397_v29, 16 }
  0xf6   : > { %v1239_v41 = vpack.c.bf16 %v948_v50, %v946_v46  ;;  %vm651_vm6 = vcmp.eq.s32.totalorder %v395_v52, 17  ;;  %vm653_vm7 = vcmp.eq.s32.totalorder %v397_v29, 17  ;;  %v394_v51 = vsub.s32 %v1822_v5, %v1868_v21 }
  0xf7   : > { %v726_v44 = vsel %vm651_vm6, %v1894_v42, 0.0  ;;  %v728_v32 = vsel %vm653_vm7, %v1894_v42, 0.0  ;;  %v396_v54 = vsub.s32 %v1825_v6, %v1868_v21  ;;  %v399_v28 = vsub.s32 %v1832_v8, %v1862_v19 }
  0xf8   : > { %1240 = vmatpush1.bf16.msra.mxu0 %v1239_v41  ;;  %v801_v48 = vsel %vm587_vm3, %v1888_v34, %v726_v44  ;;  %v803_v56 = vsel %vm589_vm5, %v1888_v34, %v728_v32  ;;  %vm458_vm10 = vcmp.eq.s32.totalorder %v394_v51, 0  ;;  %vm522_vm12 = vcmp.eq.s32.totalorder %v394_v51, 1 }
  0xf9   : > { %v876_v5 = vsel %vm523_vm0, %v1875_v23, %v801_v48  ;;  %v878_v49 = vsel %vm525_vm4, %v1875_v23, %v803_v56  ;;  %vm460_vm8 = vcmp.eq.s32.totalorder %v396_v54, 0  ;;  %vm524_vm11 = vcmp.eq.s32.totalorder %v396_v54, 1 }
  0xfa   : > { %v951_v6 = vsel %vm459_vm2, %v1865_v20, %v876_v5  ;;  %v953_v57 = vsel %vm461_vm1, %v1865_v20, %v878_v49  ;;  %vm586_vm9 = vcmp.eq.s32.totalorder %v394_v51, 16  ;;  %vm588_vm13 = vcmp.eq.s32.totalorder %v396_v54, 16 }
  0xfb   : > { %v1241_v55 = vpack.c.bf16 %v953_v57, %v951_v6  ;;  %vm650_vm14 = vcmp.eq.s32.totalorder %v394_v51, 17  ;;  %vm652_vm15 = vcmp.eq.s32.totalorder %v396_v54, 17  ;;  %v401_v58 = vsub.s32 %v1839_v13, %v1862_v19 }
  0xfc   : > { %v725_v59 = vsel %vm650_vm14, %v1891_v38, 0.0  ;;  %v727_v60 = vsel %vm652_vm15, %v1891_v38, 0.0  ;;  %vm463_vm0 = vcmp.eq.s32.totalorder %v399_v28, 0  ;;  %vm527_vm4 = vcmp.eq.s32.totalorder %v399_v28, 1 }
  0xfd   : > { %1242 = vmatprep.subr.bf16.mxu0 %v1241_v55  ;;  %v800_v63 = vsel %vm586_vm9, %v1913_v1, %v725_v59  ;;  %v802_v0 = vsel %vm588_vm13, %v1913_v1, %v727_v60  ;;  %vm465_vm2 = vcmp.eq.s32.totalorder %v401_v58, 0  ;;  %vm529_vm1 = vcmp.eq.s32.totalorder %v401_v58, 1 }
  0xfe   : > { %v875_v2 = vsel %vm522_vm12, %v1878_v25, %v800_v63  ;;  %v877_v3 = vsel %vm524_vm11, %v1878_v25, %v802_v0  ;;  %vm591_vm3 = vcmp.eq.s32.totalorder %v399_v28, 16  ;;  %vm593_vm5 = vcmp.eq.s32.totalorder %v401_v58, 16 }
  0xff   : > { %v950_v45 = vsel %vm458_vm10, %v1881_v26, %v875_v2  ;;  %v952_v39 = vsel %vm460_vm8, %v1881_v26, %v877_v3  ;;  %vm655_vm6 = vcmp.eq.s32.totalorder %v399_v28, 17  ;;  %vm657_vm7 = vcmp.eq.s32.totalorder %v401_v58, 17 }
 0x100   : > { %v1243_v9 = vpack.c.bf16 %v952_v39, %v950_v45  ;;  %v730_v40 = vsel %vm655_vm6, %v1894_v42, 0.0  ;;  %v732_v10 = vsel %vm657_vm7, %v1894_v42, 0.0  ;;  %v398_v4 = vsub.s32 %v1832_v8, %v1868_v21 }
 0x101   : > { %v805_v61 = vsel %vm591_vm3, %v1888_v34, %v730_v40  ;;  %v807_v7 = vsel %vm593_vm5, %v1888_v34, %v732_v10  ;;  %v400_v12 = vsub.s32 %v1839_v13, %v1868_v21  ;;  %v403_v47 = vsub.s32 %v1846_v14, %v1862_v19 }
 0x102   : > { %1244 = vmatpush1.bf16.msra.mxu0 %v1243_v9  ;;  %v880_v33 = vsel %vm527_vm4, %v1875_v23, %v805_v61  ;;  %v882_v35 = vsel %vm529_vm1, %v1875_v23, %v807_v7  ;;  %vm462_vm10 = vcmp.eq.s32.totalorder %v398_v4, 0  ;;  %vm526_vm12 = vcmp.eq.s32.totalorder %v398_v4, 1 }
 0x103   : > { %v955_v8 = vsel %vm463_vm0, %v1865_v20, %v880_v33  ;;  %v957_v36 = vsel %vm465_vm2, %v1865_v20, %v882_v35  ;;  %vm464_vm8 = vcmp.eq.s32.totalorder %v400_v12, 0  ;;  %vm528_vm11 = vcmp.eq.s32.totalorder %v400_v12, 1 }
 0x104   : > { %v1245_v13 = vpack.c.bf16 %v957_v36, %v955_v8  ;;  %vm590_vm9 = vcmp.eq.s32.totalorder %v398_v4, 16  ;;  %vm592_vm13 = vcmp.eq.s32.totalorder %v400_v12, 16  ;;  %vm654_vm14 = vcmp.eq.s32.totalorder %v398_v4, 17 }
 0x105   : > { %vm656_vm15 = vcmp.eq.s32.totalorder %v400_v12, 17  ;;  %v729_v18 = vsel %vm654_vm14, %v1891_v38, 0.0  ;;  %v405_v62 = vsub.s32 %v1849_v15, %v1862_v19  ;;  %vm467_vm4 = vcmp.eq.s32.totalorder %v403_v47, 0 }
 0x106   : > { %1246 = vmatprep.subr.bf16.mxu0 %v1245_v13  ;;  %v731_v37 = vsel %vm656_vm15, %v1891_v38, 0.0  ;;  %v804_v52 = vsel %vm590_vm9, %v1913_v1, %v729_v18  ;;  %vm531_vm0 = vcmp.eq.s32.totalorder %v403_v47, 1  ;;  %vm595_vm2 = vcmp.eq.s32.totalorder %v403_v47, 16 }
 0x107   : > { %v806_v22 = vsel %vm592_vm13, %v1913_v1, %v731_v37  ;;  %v879_v53 = vsel %vm526_vm12, %v1878_v25, %v804_v52  ;;  %vm469_vm1 = vcmp.eq.s32.totalorder %v405_v62, 0  ;;  %vm533_vm3 = vcmp.eq.s32.totalorder %v405_v62, 1 }
 0x108   : > { %v881_v27 = vsel %vm528_vm11, %v1878_v25, %v806_v22  ;;  %v954_v29 = vsel %vm462_vm10, %v1881_v26, %v879_v53  ;;  %vm597_vm5 = vcmp.eq.s32.totalorder %v405_v62, 16  ;;  %vm659_vm6 = vcmp.eq.s32.totalorder %v403_v47, 17 }
 0x109   : > { %v956_v30 = vsel %vm464_vm8, %v1881_v26, %v881_v27  ;;  %vm661_vm7 = vcmp.eq.s32.totalorder %v405_v62, 17  ;;  %v734_v43 = vsel %vm659_vm6, %v1894_v42, 0.0  ;;  %v402_v31 = vsub.s32 %v1846_v14, %v1868_v21 }
 0x10a   : > { %v1247_v11 = vpack.c.bf16 %v956_v30, %v954_v29  ;;  %v736_v46 = vsel %vm661_vm7, %v1894_v42, 0.0  ;;  %v809_v50 = vsel %vm595_vm2, %v1888_v34, %v734_v43  ;;  %v404_v41 = vsub.s32 %v1849_v15, %v1868_v21 }
 0x10b   : > { %v811_v51 = vsel %vm597_vm5, %v1888_v34, %v736_v46  ;;  %v884_v44 = vsel %vm531_vm0, %v1875_v23, %v809_v50  ;;  %vm466_vm10 = vcmp.eq.s32.totalorder %v402_v31, 0  ;;  %vm530_vm12 = vcmp.eq.s32.totalorder %v402_v31, 1 }
 0x10c   : > { %1248 = vmatpush1.bf16.msra.mxu0 %v1247_v11  ;;  %v886_v32 = vsel %vm533_vm3, %v1875_v23, %v811_v51  ;;  %v959_v14 = vsel %vm467_vm4, %v1865_v20, %v884_v44  ;;  %vm468_vm8 = vcmp.eq.s32.totalorder %v404_v41, 0  ;;  %vm532_vm11 = vcmp.eq.s32.totalorder %v404_v41, 1  ;;  %v974_v11 = vld [vmem:[%s1737_s5] sm:$0xff]  ;;  %s1071_s5 = sshll.u32 %s233_s6, 4  ;;  %s2423_s5 = int_to_ptr.vmem [resolvable:$true] %s1071_s5 }
 0x10d   : > { %v961_v54 = vsel %vm469_vm1, %v1865_v20, %v886_v32  ;;  %vm594_vm9 = vcmp.eq.s32.totalorder %v402_v31, 16  ;;  %vm596_vm13 = vcmp.eq.s32.totalorder %v404_v41, 16  ;;  %vm658_vm14 = vcmp.eq.s32.totalorder %v402_v31, 17  ;;  %s1424_s27 = scalar_lea.vmem %s2423_s5, 128  ;;  %p1431_p9 = scmp.lt.s32.totalorder %s2423_s5, %s1429_s24 }
 0x10e   : > { %v1249_v15 = vpack.c.bf16 %v961_v54, %v959_v14  ;;  %vm660_vm15 = vcmp.eq.s32.totalorder %v404_v41, 17  ;;  %v733_v28 = vsel %vm658_vm14, %v1891_v38, 0.0  ;;  %v407_v48 = vsub.s32 %v1852_v16, %v1862_v19  ;;  %p1425_p1 = scmp.ne.s32.totalorder %s2423_s5, %s1424_s27  ;;  %p1432_p0 = scmp.lt.s32.totalorder %s1430_s11, %s1424_s27 }
 0x10f   : > { %v735_v56 = vsel %vm660_vm15, %v1891_v38, 0.0  ;;  %v808_v5 = vsel %vm594_vm9, %v1913_v1, %v733_v28  ;;  %v409_v49 = vsub.s32 %v1855_v17, %v1862_v19  ;;  %v406_v6 = vsub.s32 %v1852_v16, %v1868_v21 }
 0x110   : > { %1250 = vmatprep.subr.bf16.mxu0 %v1249_v15  ;;  %v810_v57 = vsel %vm596_vm13, %v1913_v1, %v735_v56  ;;  %v883_v55 = vsel %vm530_vm12, %v1878_v25, %v808_v5  ;;  %vm471_vm4 = vcmp.eq.s32.totalorder %v407_v48, 0  ;;  %vm535_vm0 = vcmp.eq.s32.totalorder %v407_v48, 1  ;;  %p1426_p4 = pnand %p1425_p1, %p1674_p8  ;;  %p1433_p11 = por %p1432_p0, %p1431_p9 }
 0x111   : > { %v885_v58 = vsel %vm532_vm11, %v1878_v25, %v810_v57  ;;  %v958_v59 = vsel %vm466_vm10, %v1881_v26, %v883_v55  ;;  %vm473_vm2 = vcmp.eq.s32.totalorder %v409_v49, 0  ;;  %vm537_vm1 = vcmp.eq.s32.totalorder %v409_v49, 1 }
 0x112   : > { %v960_v60 = vsel %vm468_vm8, %v1881_v26, %v885_v58  ;;  %vm599_vm3 = vcmp.eq.s32.totalorder %v407_v48, 16  ;;  %vm601_vm5 = vcmp.eq.s32.totalorder %v409_v49, 16  ;;  %vm663_vm6 = vcmp.eq.s32.totalorder %v407_v48, 17  ;;  %p1427_p6 = pneg %p1426_p4 }
 0x113   : > { %v1251_v16 = vpack.c.bf16 %v960_v60, %v958_v59  ;;  %vm665_vm7 = vcmp.eq.s32.totalorder %v409_v49, 17  ;;  %v738_v63 = vsel %vm663_vm6, %v1894_v42, 0.0  ;;  %v408_v0 = vsub.s32 %v1855_v17, %v1868_v21 }
 0x114   : > { %v740_v2 = vsel %vm665_vm7, %v1894_v42, 0.0  ;;  %v813_v3 = vsel %vm599_vm3, %v1888_v34, %v738_v63  ;;  %vm470_vm10 = vcmp.eq.s32.totalorder %v406_v6, 0  ;;  %vm534_vm12 = vcmp.eq.s32.totalorder %v406_v6, 1  ;;  %p1434_p5 = pnand %p1433_p11, %p1427_p6 }
 0x115   : > { %1252 = vmatpush1.bf16.msra.mxu0 %v1251_v16  ;;  %v815_v45 = vsel %vm601_vm5, %v1888_v34, %v740_v2  ;;  %v888_v39 = vsel %vm535_vm0, %v1875_v23, %v813_v3  ;;  %vm472_vm8 = vcmp.eq.s32.totalorder %v408_v0, 0  ;;  %vm536_vm11 = vcmp.eq.s32.totalorder %v408_v0, 1 }
 0x116   : > { %v890_v9 = vsel %vm537_vm1, %v1875_v23, %v815_v45  ;;  %v963_v17 = vsel %vm471_vm4, %v1865_v20, %v888_v39  ;;  %vm598_vm9 = vcmp.eq.s32.totalorder %v406_v6, 16  ;;  %vm600_vm13 = vcmp.eq.s32.totalorder %v408_v0, 16 }
 0x117   : > { %v965_v40 = vsel %vm473_vm2, %v1865_v20, %v890_v9  ;;  %vm662_vm14 = vcmp.eq.s32.totalorder %v406_v6, 17  ;;  %vm664_vm15 = vcmp.eq.s32.totalorder %v408_v0, 17  ;;  %v268_v10 = vadd.s32 224, %v1744_v24 }
 0x118   : > { %v1253_v4 = vpack.c.bf16 %v965_v40, %v963_v17  ;;  %v737_v61 = vsel %vm662_vm14, %v1891_v38, 0.0  ;;  %v739_v7 = vsel %vm664_vm15, %v1891_v38, 0.0  ;;  %v269_v12 = vadd.s32 232, %v1744_v24 }
 0x119   : > { %v812_v47 = vsel %vm598_vm9, %v1913_v1, %v737_v61  ;;  %v814_v33 = vsel %vm600_vm13, %v1913_v1, %v739_v7  ;;  %v411_v35 = vsub.s32 %v268_v10, %v1862_v19  ;;  %v410_v8 = vsub.s32 %v268_v10, %v1868_v21 }
 0x11a   : > { %1254 = vmatprep.subr.bf16.mxu0 %v1253_v4  ;;  %v887_v36 = vsel %vm534_vm12, %v1878_v25, %v812_v47  ;;  %v889_v13 = vsel %vm536_vm11, %v1878_v25, %v814_v33  ;;  %v413_v18 = vsub.s32 %v269_v12, %v1862_v19  ;;  %v412_v62 = vsub.s32 %v269_v12, %v1868_v21 }
 0x11b   : > { %v962_v37 = vsel %vm470_vm10, %v1881_v26, %v887_v36  ;;  %v964_v52 = vsel %vm472_vm8, %v1881_v26, %v889_v13  ;;  %vm475_vm4 = vcmp.eq.s32.totalorder %v411_v35, 0  ;;  %vm539_vm0 = vcmp.eq.s32.totalorder %v411_v35, 1 }
 0x11c   : > { %v1255_v22 = vpack.c.bf16 %v964_v52, %v962_v37  ;;  %vm477_vm2 = vcmp.eq.s32.totalorder %v413_v18, 0  ;;  %vm541_vm1 = vcmp.eq.s32.totalorder %v413_v18, 1  ;;  %vm603_vm3 = vcmp.eq.s32.totalorder %v411_v35, 16 }
 0x11d   : > { %vm605_vm5 = vcmp.eq.s32.totalorder %v413_v18, 16  ;;  %vm667_vm6 = vcmp.eq.s32.totalorder %v411_v35, 17  ;;  %vm669_vm7 = vcmp.eq.s32.totalorder %v413_v18, 17  ;;  %vm474_vm12 = vcmp.eq.s32.totalorder %v410_v8, 0 }
 0x11e   : > { %1256 = vmatpush1.bf16.msra.mxu0 %v1255_v22  ;;  %v742_v53 = vsel %vm667_vm6, %v1894_v42, 0.0  ;;  %v744_v27 = vsel %vm669_vm7, %v1894_v42, 0.0  ;;  %vm476_vm10 = vcmp.eq.s32.totalorder %v412_v62, 0  ;;  %vm538_vm11 = vcmp.eq.s32.totalorder %v410_v8, 1 }
 0x11f   : > { %v817_v29 = vsel %vm603_vm3, %v1888_v34, %v742_v53  ;;  %v819_v30 = vsel %vm605_vm5, %v1888_v34, %v744_v27  ;;  %vm540_vm8 = vcmp.eq.s32.totalorder %v412_v62, 1  ;;  %vm602_vm9 = vcmp.eq.s32.totalorder %v410_v8, 16 }
 0x120   : > { %v892_v43 = vsel %vm539_vm0, %v1875_v23, %v817_v29  ;;  %v894_v31 = vsel %vm541_vm1, %v1875_v23, %v819_v30  ;;  %vm604_vm13 = vcmp.eq.s32.totalorder %v412_v62, 16  ;;  %vm666_vm14 = vcmp.eq.s32.totalorder %v410_v8, 17 }
 0x121   : > { %v967_v46 = vsel %vm475_vm4, %v1865_v20, %v892_v43  ;;  %v969_v50 = vsel %vm477_vm2, %v1865_v20, %v894_v31  ;;  %vm668_vm15 = vcmp.eq.s32.totalorder %v412_v62, 17  ;;  %v741_v41 = vsel %vm666_vm14, %v1891_v38, 0.0 }
 0x122   : > { %v1257_v51 = vpack.c.bf16 %v969_v50, %v967_v46  ;;  %v743_v44 = vsel %vm668_vm15, %v1891_v38, 0.0  ;;  %v816_v32 = vsel %vm602_vm9, %v1913_v1, %v741_v41  ;;  %v270_v14 = vadd.s32 240, %v1744_v24 }
 0x123   : > { %v818_v54 = vsel %vm604_vm13, %v1913_v1, %v743_v44  ;;  %v891_v15 = vsel %vm538_vm11, %v1878_v25, %v816_v32  ;;  %v271_v28 = vadd.s32 248, %v1744_v24  ;;  %v976_v48 = vcombine.high %v974_v11, %v974_v11 }
 0x124   : > { %1258 = vmatprep.subr.bf16.mxu0 %v1257_v51  ;;  %v893_v56 = vsel %vm540_vm8, %v1878_v25, %v818_v54  ;;  %v966_v5 = vsel %vm474_vm12, %v1881_v26, %v891_v15  ;;  %v415_v49 = vsub.s32 %v270_v14, %v1862_v19  ;;  %v414_v55 = vsub.s32 %v270_v14, %v1868_v21 }
 0x125   : > { %v968_v6 = vsel %vm476_vm10, %v1881_v26, %v893_v56  ;;  %v417_v57 = vsub.s32 %v271_v28, %v1862_v19  ;;  %1042 = vmatprep.mubr.f32.mxu0 %v976_v48  ;;  %v416_v24 = vsub.s32 %v271_v28, %v1868_v21 }
 0x126   : > { %v1259_v58 = vpack.c.bf16 %v968_v6, %v966_v5  ;;  %vm479_vm4 = vcmp.eq.s32.totalorder %v415_v49, 0  ;;  %vm607_vm0 = vcmp.eq.s32.totalorder %v415_v49, 16  ;;  %vm543_vm1 = vcmp.eq.s32.totalorder %v415_v49, 1 }
 0x127   : > { %vm481_vm2 = vcmp.eq.s32.totalorder %v417_v57, 0  ;;  %vm609_vm3 = vcmp.eq.s32.totalorder %v417_v57, 16  ;;  %vm671_vm5 = vcmp.eq.s32.totalorder %v415_v49, 17  ;;  %vm545_vm6 = vcmp.eq.s32.totalorder %v417_v57, 1 }
 0x128   : > { %1260 = vmatpush1.bf16.msra.mxu0 %v1259_v58  ;;  %vm673_vm7 = vcmp.eq.s32.totalorder %v417_v57, 17  ;;  %v746_v59 = vsel %vm671_vm5, %v1894_v42, 0.0  ;;  %vm478_vm12 = vcmp.eq.s32.totalorder %v414_v55, 0  ;;  %vm542_vm10 = vcmp.eq.s32.totalorder %v414_v55, 1 }
 0x129   : > { %v748_v19 = vsel %vm673_vm7, %v1894_v42, 0.0  ;;  %v821_v60 = vsel %vm607_vm0, %v1888_v34, %v746_v59  ;;  %vm544_vm11 = vcmp.eq.s32.totalorder %v416_v24, 1  ;;  %vm606_vm8 = vcmp.eq.s32.totalorder %v414_v55, 16 }
 0x12a   : > { %v823_v16 = vsel %vm609_vm3, %v1888_v34, %v748_v19  ;;  %v896_v21 = vsel %vm543_vm1, %v1875_v23, %v821_v60  ;;  %vm608_vm9 = vcmp.eq.s32.totalorder %v416_v24, 16  ;;  %vm670_vm13 = vcmp.eq.s32.totalorder %v414_v55, 17 }
 0x12b   : > { %v898_v63 = vsel %vm545_vm6, %v1875_v23, %v823_v16  ;;  %v971_v0 = vsel %vm479_vm4, %v1865_v20, %v896_v21  ;;  %vm672_vm14 = vcmp.eq.s32.totalorder %v416_v24, 17  ;;  %vm480_vm15 = vcmp.eq.s32.totalorder %v416_v24, 0 }
 0x12c   : > { %v973_v42 = vsel %vm481_vm2, %v1865_v20, %v898_v63  ;;  %v745_v2 = vsel %vm670_vm13, %v1891_v38, 0.0  ;;  %v747_v34 = vsel %vm672_vm14, %v1891_v38, 0.0 }
 0x12d   : > { %v1261_v3 = vpack.c.bf16 %v973_v42, %v971_v0  ;;  %v820_v45 = vsel %vm606_vm8, %v1913_v1, %v745_v2  ;;  %v822_v23 = vsel %vm608_vm9, %v1913_v1, %v747_v34 }
 0x12e   : > { %v895_v39 = vsel %vm542_vm10, %v1878_v25, %v820_v45  ;;  %v897_v9 = vsel %vm544_vm11, %v1878_v25, %v822_v23 }
 0x12f   : > { %1262 = vmatprep.subr.bf16.mxu0 %v1261_v3  ;;  %v970_v20 = vsel %vm478_vm12, %v1881_v26, %v895_v39  ;;  %v972_v17 = vsel %vm480_vm15, %v1881_v26, %v897_v9 }
 0x130   : > { %v1263_v38 = vpack.c.bf16 %v972_v17, %v970_v20 }
 0x132   : > { %1264 = vmatpush1.bf16.msra.mxu0 %v1263_v38 }
 0x135   : > { %1043 = vmatmul.mubr.f32.vlgmr.msra.gmra.mrb[0].mxu0 %v974_v11 }
 0x208   : > { %v1044_v1 = vpop.f32.mrb[0].mxu0 }
 0x209   : > { %v1046_v40 = vpop.f32.mrb[1].mxu0 }
 0x20a   : > { %v1051_v10 = vcombine.low %v1044_v1, %v1046_v40 }
 0x20c   : > { %1053 = vst [vmem:[%s233_s6] sm:$0xff] %v1051_v10 }
 0x20d   : > { %1437 = shalt.err (!%p1434_p5)
}
 0x20e   : > { %s1438_s7 = scalar_lea.hbm %s2421_s9, 128  ;;  %s1442_s26 = scalar_lea.hbm %s2473_s3, 256 }
 0x20f   : > { %p1439_p10 = scmp.ne.s32.totalorder %s2421_s9, %s1438_s7  ;;  %p1443_p7 = scmp.lt.u32.totalorder %s2421_s9, %s2473_s3 }
 0x210   : > { %p1444_p12 = scmp.lt.u32.totalorder %s1442_s26, %s1438_s7  ;;  %p1446_p1 = scmp.lt.u32.totalorder %s1438_s7, %s2421_s9 }
 0x211   : > { %p1440_p13 = pnand %p1439_p10, %p1674_p8 }
 0x212   : > { %p1445_p2 = por %p1444_p12, %p1443_p7 }
 0x213   : > { %p1441_p3 = pneg %p1440_p13 }
 0x214   : > { %p1447_p4 = por %p1446_p1, %p1445_p2 }
 0x216   : > { %p1448_p6 = pnand %p1447_p4, %p1441_p3 }
 0x218   : > { %1451 = shalt.err (!%p1448_p6)
}
 0x219   : > { %1279 = dma.vmem_to_hbm [thread:$0]  (%p1674_p8), %s2423_s5, 128, %s2421_s9, %s1055_s10  }
 0x21a PF: > { %s1083_s21 = sand.u32 1, %s1494_s12   ;;  %p2498_p9 = scmp.ne.s32.totalorder %s2481_s23, 0 }
 0x21b   : > { %p2499_p0 = scmp.ge.s32.totalorder %s1514_s17, 2  ;;  %s1084_s22 = scalar_lea.sflag [#allocation4], %s1083_s21 }
 0x21d   : > { %p1293_p11 = pnand %p2499_p0, %p2498_p9 }
 0x21f   : > { %1489 = dma.done.wait (!%p1293_p11), %s1084_s22, 128  }
 0x220   : > { %1491 = vsyncadd (!%p1293_p11), %s1084_s22, 4294967168  ;;  %s21_s17 = sadd.s32 1, %s1514_s17   ;;  %s2500_s12 = smov %s1498_s13 }
 0x221   : > { %p18_p5 = scmp.ge.s32.totalorder %s21_s17, 4   ;;  %s2501_s13 = smov %s1502_s14 }
 0x222   : > { %s2502_s14 = smov %s1680_s19  ;;  %s2503_s15 = smov %s1510_s16 }
 0x223   : > { %s2504_s16 = smov %s2506_s28  ;;  %20 = sbr.rel (!%p18_p5) target bundleno = 8 (0x8), region = 89 }
 0x22a   :  { %1089 = vsyncpa [#allocation3], 1 }
 0x22b   :  { %1091 = vsyncpa [#allocation3 + $0x1], 1 }
 0x22c   :  { %1092 = vsyncpa [#allocation8], 1 }
 0x22d   :  { %1094 = vsyncpa [#allocation8 + $0x1], 1 }
 0x22e   :  { %1095 = vsyncpa [#allocation4], 1 }
 0x22f   :  { %1097 = vsyncpa [#allocation4 + $0x1], 1 }
 0x230   :  { %1098 = vsyncpa [#allocation5], 1 }
 0x231   :  { %1100 = vsyncpa [#allocation5 + $0x1], 1 }

</bundles_post_ra>
